<compile_context>
chip_gen: v5e
topology: v5e:2x2
jax: 0.10.0
libtpu: 0.0.40
codegen_flags: <defaults>
</compile_context>

<pallas_src>
import jax
import jax.numpy as jnp
from jax.experimental import pallas as pl
from jax.experimental.pallas import tpu as pltpu

K_IN = 28 * 28        # 784
K_PAD = 896           # 7 * 128, lane-dense K
HIDDEN = 128
N_OUT = 10
N_PAD = 128           # lane-dense output width


def mnist_mlp_kernel(x_ref, w1_ref, b1_ref, w2_ref, b2_ref, o_ref):
    # x_ref : [TB, 896]  bf16      w1_ref: [896, 128] bf16   b1_ref: [1, 128] f32
    # w2_ref: [128, 128] bf16      b2_ref: [1, 128]   f32    o_ref : [TB, 128] f32
    h = jnp.dot(x_ref[...], w1_ref[...],
                preferred_element_type=jnp.float32) + b1_ref[...]
    h = jnp.maximum(h, 0.0)                                    # ReLU (f32)
    y = jnp.dot(h.astype(jnp.bfloat16), w2_ref[...],
                preferred_element_type=jnp.float32) + b2_ref[...]
    o_ref[...] = jax.nn.sigmoid(y)                             # Sigmoid (f32)


def prepare_params(w1, b1, w2, b2):
    """Pad/cast PyTorch-layout-equivalent params ([in,out] f32) for the kernel."""
    w1p = jnp.zeros((K_PAD, HIDDEN), jnp.bfloat16).at[:K_IN, :].set(
        w1.astype(jnp.bfloat16))
    b1p = b1.reshape(1, HIDDEN).astype(jnp.float32)
    w2p = jnp.zeros((HIDDEN, N_PAD), jnp.bfloat16).at[:, :N_OUT].set(
        w2.astype(jnp.bfloat16))
    b2p = jnp.zeros((1, N_PAD), jnp.float32).at[:, :N_OUT].set(
        b2.reshape(1, N_OUT))
    return w1p, b1p, w2p, b2p


def mnist_net_forward(x_nchw, w1p, b1p, w2p, b2p, *, tb=256):
    """x_nchw: [B, 1, 28, 28] float32. Returns [B, 10] float32."""
    B = x_nchw.shape[0]
    x2d = jnp.reshape(x_nchw, (B, K_IN)).astype(jnp.bfloat16)  # nn.Flatten + bf16
    n_blocks = pl.cdiv(B, tb)
    b_pad = n_blocks * tb
    # Zero-pad batch to a tile multiple and K to 896 (lane-dense).
    xp = jnp.zeros((b_pad, K_PAD), jnp.bfloat16).at[:B, :K_IN].set(x2d)

    out = pl.pallas_call(
        mnist_mlp_kernel,
        out_shape=jax.ShapeDtypeStruct((b_pad, N_PAD), jnp.float32),
        grid_spec=pltpu.PrefetchScalarGridSpec(
            num_scalar_prefetch=0,
            grid=(n_blocks,),
            in_specs=[
                pl.BlockSpec((tb, K_PAD), lambda i: (i, 0)),        # x: streamed
                pl.BlockSpec((K_PAD, HIDDEN), lambda i: (0, 0)),    # w1: resident
                pl.BlockSpec((1, HIDDEN), lambda i: (0, 0)),        # b1: resident
                pl.BlockSpec((HIDDEN, N_PAD), lambda i: (0, 0)),    # w2: resident
                pl.BlockSpec((1, N_PAD), lambda i: (0, 0)),         # b2: resident
            ],
            out_specs=pl.BlockSpec((tb, N_PAD), lambda i: (i, 0)),  # lane-dense out
        ),
        compiler_params=pltpu.CompilerParams(
            dimension_semantics=("parallel",),   # shard batch across TCs on v7x
        ),
    )(xp, w1p, b1p, w2p, b2p)

    return out[:B, :N_OUT]


def init_params(key):
    """Deterministic init matching PyTorch nn.Linear default U(-1/sqrt(fan_in), +)."""
    k1, k2, k3, k4 = jax.random.split(key, 4)
    bound1 = 1.0 / jnp.sqrt(K_IN)
    bound2 = 1.0 / jnp.sqrt(HIDDEN)
    # Stored as [in, out] (transposed vs PyTorch's [out, in]).
    w1 = jax.random.uniform(k1, (K_IN, HIDDEN), jnp.float32, -bound1, bound1)
    b1 = jax.random.uniform(k2, (HIDDEN,), jnp.float32, -bound1, bound1)
    w2 = jax.random.uniform(k3, (HIDDEN, N_OUT), jnp.float32, -bound2, bound2)
    b2 = jax.random.uniform(k4, (N_OUT,), jnp.float32, -bound2, bound2)
    return w1, b1, w2, b2


if __name__ == "__main__":
    key = jax.random.PRNGKey(0)
    kx, kp = jax.random.split(key)

    B = 8
    x = jax.random.normal(kx, (B, 1, 28, 28), jnp.float32)     # MNIST-shaped input
    w1, b1, w2, b2 = init_params(kp)
    w1p, b1p, w2p, b2p = prepare_params(w1, b1, w2, b2)

    out = mnist_net_forward(x, w1p, b1p, w2p, b2p)
    out = jax.block_until_ready(out)
    assert out.shape == (B, N_OUT)

    # Reference 1: exact same bf16-input / f32-accumulate arithmetic in plain JAX.
    x2d = x.reshape(B, K_IN)
    xb = x2d.astype(jnp.bfloat16)
    w1b = w1.astype(jnp.bfloat16)
    w2b = w2.astype(jnp.bfloat16)
    h = jnp.maximum(
        jnp.dot(xb, w1b, preferred_element_type=jnp.float32) + b1, 0.0)
    ref_bf16 = jax.nn.sigmoid(
        jnp.dot(h.astype(jnp.bfloat16), w2b, preferred_element_type=jnp.float32) + b2)
    assert jnp.allclose(out, ref_bf16, atol=1e-4, rtol=1e-4), \
        float(jnp.max(jnp.abs(out - ref_bf16)))

    # Reference 2: pure f32 PyTorch-equivalent forward (loose tolerance for bf16).
    ref_f32 = jax.nn.sigmoid(jnp.maximum(x2d @ w1 + b1, 0.0) @ w2 + b2)
    assert jnp.allclose(out, ref_f32, atol=5e-2, rtol=5e-2), \
        float(jnp.max(jnp.abs(out - ref_f32)))

    print("KERNEL_OK")
</pallas_src>

<mosaic_0001>
module attributes {stable_mosaic.version = 11 : i64} {
  func.func @mnist_mlp_kernel(%arg0: i32, %arg1: memref<256x896xbf16, #tpu.memory_space<vmem>>, %arg2: memref<896x128xbf16, #tpu.memory_space<vmem>>, %arg3: memref<1x128xf32, #tpu.memory_space<vmem>>, %arg4: memref<128x128xbf16, #tpu.memory_space<vmem>>, %arg5: memref<1x128xf32, #tpu.memory_space<vmem>>, %arg6: memref<256x128xf32, #tpu.memory_space<vmem>>) attributes {dimension_semantics = [#tpu.dimension_semantics<parallel>], iteration_bounds = array<i64: 1>, scalar_prefetch = 0 : i64, scratch_operands = 0 : i64, tpu.core_type = #tpu.core_type<tc>, window_params = [{transform_indices = @transform_0, window_bounds = array<i64: 256, 896>}, {pipeline_mode = #tpu.pipeline_mode<synchronous>, transform_indices = @transform_1, window_bounds = array<i64: 896, 128>}, {pipeline_mode = #tpu.pipeline_mode<synchronous>, transform_indices = @transform_2, window_bounds = array<i64: 1, 128>}, {pipeline_mode = #tpu.pipeline_mode<synchronous>, transform_indices = @transform_3, window_bounds = array<i64: 128, 128>}, {pipeline_mode = #tpu.pipeline_mode<synchronous>, transform_indices = @transform_4, window_bounds = array<i64: 1, 128>}, {transform_indices = @transform_5, window_bounds = array<i64: 256, 128>}]} {
    %c0 = arith.constant 0 : index
    %c0_0 = arith.constant 0 : index
    %0 = vector.load %arg1[%c0, %c0_0] : memref<256x896xbf16, #tpu.memory_space<vmem>>, vector<256x896xbf16>
    %c0_1 = arith.constant 0 : index
    %c0_2 = arith.constant 0 : index
    %1 = vector.load %arg2[%c0_1, %c0_2] : memref<896x128xbf16, #tpu.memory_space<vmem>>, vector<896x128xbf16>
    %cst = arith.constant dense<0.000000e+00> : vector<256x128xf32>
    %2 = tpu.matmul %0, %1, %cst {dimension_numbers = #tpu.dot_dimension_numbers<[1], [0], [0], [1], [0, 0, 1, 1], [], []>} : vector<256x896xbf16>, vector<896x128xbf16>, vector<256x128xf32> -> vector<256x128xf32>
    %c0_3 = arith.constant 0 : index
    %c0_4 = arith.constant 0 : index
    %3 = vector.load %arg3[%c0_3, %c0_4] : memref<1x128xf32, #tpu.memory_space<vmem>>, vector<1x128xf32>
    %4 = vector.broadcast %3 : vector<1x128xf32> to vector<256x128xf32>
    %5 = arith.addf %2, %4 : vector<256x128xf32>
    %cst_5 = arith.constant 0.000000e+00 : f32
    %6 = vector.broadcast %cst_5 : f32 to vector<256x128xf32>
    %7 = arith.maximumf %5, %6 : vector<256x128xf32>
    %8 = arith.truncf %7 : vector<256x128xf32> to vector<256x128xbf16>
    %c0_6 = arith.constant 0 : index
    %c0_7 = arith.constant 0 : index
    %9 = vector.load %arg4[%c0_6, %c0_7] : memref<128x128xbf16, #tpu.memory_space<vmem>>, vector<128x128xbf16>
    %cst_8 = arith.constant dense<0.000000e+00> : vector<256x128xf32>
    %10 = tpu.matmul %8, %9, %cst_8 {dimension_numbers = #tpu.dot_dimension_numbers<[1], [0], [0], [1], [0, 0, 1, 1], [], []>} : vector<256x128xbf16>, vector<128x128xbf16>, vector<256x128xf32> -> vector<256x128xf32>
    %c0_9 = arith.constant 0 : index
    %c0_10 = arith.constant 0 : index
    %11 = vector.load %arg5[%c0_9, %c0_10] : memref<1x128xf32, #tpu.memory_space<vmem>>, vector<1x128xf32>
    %12 = vector.broadcast %11 : vector<1x128xf32> to vector<256x128xf32>
    %13 = arith.addf %10, %12 : vector<256x128xf32>
    %14 = arith.negf %13 : vector<256x128xf32>
    %15 = math.exp %14 : vector<256x128xf32>
    %cst_11 = arith.constant 1.000000e+00 : f32
    %16 = vector.broadcast %cst_11 : f32 to vector<256x128xf32>
    %17 = arith.addf %16, %15 : vector<256x128xf32>
    %18 = arith.divf %16, %17 : vector<256x128xf32>
    %c0_12 = arith.constant 0 : index
    %c0_13 = arith.constant 0 : index
    %19 = vector.load %arg6[%c0_12, %c0_13] : memref<256x128xf32, #tpu.memory_space<vmem>>, vector<256x128xf32>
    tpu.vector_store %arg6[%c0_12, %c0_13], %18 {strides = array<i32>} : memref<256x128xf32, #tpu.memory_space<vmem>>, vector<256x128xf32>,
    return
  }
  func.func @transform_0(%arg0: i32) -> (i32, i32) {
    %c0_i32 = arith.constant 0 : i32
    %c0_i32_0 = arith.constant 0 : i32
    return %arg0, %c0_i32 : i32, i32
  }
  func.func @transform_1(%arg0: i32) -> (i32, i32) {
    %c0_i32 = arith.constant 0 : i32
    %c0_i32_0 = arith.constant 0 : i32
    %c0_i32_1 = arith.constant 0 : i32
    return %c0_i32, %c0_i32_0 : i32, i32
  }
  func.func @transform_2(%arg0: i32) -> (i32, i32) {
    %c0_i32 = arith.constant 0 : i32
    %c0_i32_0 = arith.constant 0 : i32
    %c0_i32_1 = arith.constant 0 : i32
    return %c0_i32, %c0_i32_0 : i32, i32
  }
  func.func @transform_3(%arg0: i32) -> (i32, i32) {
    %c0_i32 = arith.constant 0 : i32
    %c0_i32_0 = arith.constant 0 : i32
    %c0_i32_1 = arith.constant 0 : i32
    return %c0_i32, %c0_i32_0 : i32, i32
  }
  func.func @transform_4(%arg0: i32) -> (i32, i32) {
    %c0_i32 = arith.constant 0 : i32
    %c0_i32_0 = arith.constant 0 : i32
    %c0_i32_1 = arith.constant 0 : i32
    return %c0_i32, %c0_i32_0 : i32, i32
  }
  func.func @transform_5(%arg0: i32) -> (i32, i32) {
    %c0_i32 = arith.constant 0 : i32
    %c0_i32_0 = arith.constant 0 : i32
    return %arg0, %c0_i32 : i32, i32
  }
}

</mosaic_0001>

<bundles_post_ra>
// kernel: tpu_custom_call.1
= control target key start
LH: loop header
LB: loop body
LE: loop exit
PB: predicated region body
PF: predicated region fallthrough
CT: control target
= control target key end

     0   :  { %10 = vsyncpa [#allocation3], 0  ;;  %s4158_s0 = inlined_call_operand.hbm [shape: bf16[256,896], index: 0, kind: input, shape index: {}]   ;;  %s4159_s1 = inlined_call_operand.hbm [shape: bf16[896,128], index: 1, kind: input, shape index: {}]   ;;  %s4160_s2 = inlined_call_operand.vmem [shape: f32[1,128], index: 2, kind: input, shape index: {}]   ;;  %s4161_s3 = inlined_call_operand.hbm [shape: bf16[128,128], index: 3, kind: input, shape index: {}]   ;;  %s4162_s4 = inlined_call_operand.vmem [shape: f32[1,128], index: 4, kind: input, shape index: {}]   ;;  %s4163_s5 = inlined_call_operand.hbm [shape: f32[256,128], index: 5, kind: output, shape index: {}]  }
   0x1   :  { %11 = vsyncpa [#allocation6], 0  ;;  %s30_s20 = sshll.u32 %s4159_s1, 4  ;;  %s31_s20 = int_to_ptr.hbm [resolvable:$true] %s30_s20 }
   0x2   :  { %12 = vsyncpa [#allocation4], 0  ;;  %s3867_s21 = smov [#allocation5]   ;;  %s17_s25 = sshll.u32 %s4158_s0, 4  ;;  %s18_s25 = int_to_ptr.hbm [resolvable:$true] %s17_s25 }
   0x3   :  { %s32_s22 = sshll.u32 %s3867_s21, 4  ;;  %s3868_s26 = smov 64   ;;  %s33_s22 = int_to_ptr.vmem [resolvable:$true] %s32_s22 }
   0x4   :  { %s3869_s27 = smov 4   ;;  %s3870_s28 = smov [#allocation2]  }
   0x5   :  { %38 = dma.hbm_to_vmem [thread:$0]  %s31_s20, 7168, %s33_s22, [#allocation6], %s3868_s26, %s3868_s26, %s3869_s27  }
   0x6   :  { %s19_s29 = sshll.u32 %s3870_s28, 4  ;;  %s3871_s30 = smov 448   ;;  %s20_s29 = int_to_ptr.vmem [resolvable:$true] %s19_s29 }
   0x7   :  { %s3872_s6 = smov 28   ;;  %s45_s8 = sshll.u32 %s4161_s3, 4  ;;  %s46_s8 = int_to_ptr.hbm [resolvable:$true] %s45_s8 }
   0x8   :  { %25 = dma.hbm_to_vmem [thread:$0]  %s18_s25, 14336, %s20_s29, [#allocation3], %s3871_s30, %s3871_s30, %s3872_s6  }
   0x9   :  { %s3873_s9 = smov [#allocation7]  }
   0xa   :  { %s47_s10 = sshll.u32 %s3873_s9, 4  ;;  %s48_s10 = int_to_ptr.vmem [resolvable:$true] %s47_s10 }
   0xb   :  { %53 = dma.hbm_to_vmem [thread:$0]  %s46_s8, 1024, %s48_s10, [#allocation6], %s3868_s26, %s3868_s26, %s3869_s27  }
   0xc   :  { %3861 = dma.done.wait [#allocation3], 14336  }
   0xd   :  { %3862 = vsyncadd [#allocation3], 4294952960 }
   0xe   :  { %3863 = dma.done.wait [#allocation6], 8192  }
   0xf   :  { %3864 = vsyncadd [#allocation6], 4294959104  ;;  %v3567_v0 = vld [vmem:[#allocation5 + $0x38] sm:$0xff]  ;;  %v3566_v4 = vld [vmem:[#allocation5 + $0x30] sm:$0xff]  ;;  %s2698_s17 = sshll.u32 %s4163_s5, 4  ;;  %s3875_s18 = smov 128   ;;  %s2699_s17 = int_to_ptr.hbm [resolvable:$true] %s2698_s17 }
  0x10   :  { %v3575_v1 = vld [vmem:[#allocation5 + $0x78] sm:$0xff]  ;;  %1224 = vmatpush.bf16.msra.mxu0 %v3567_v0  ;;  %v3574_v5 = vld [vmem:[#allocation5 + $0x70] sm:$0xff]  ;;  %v3565_v8 = vld [vmem:[#allocation5 + $0x28] sm:$0xff]  ;;  %s3876_s19 = smov 8  }
  0x11   :  { %v3583_v2 = vld [vmem:[#allocation5 + $0xb8] sm:$0xff]  ;;  %1313 = vmatpush.bf16.msra.mxu1 %v3575_v1  ;;  %v3582_v6 = vld [vmem:[#allocation5 + $0xb0] sm:$0xff]  ;;  %v3573_v9 = vld [vmem:[#allocation5 + $0x68] sm:$0xff] }
  0x12   :  { %v3591_v3 = vld [vmem:[#allocation5 + $0xf8] sm:$0xff]  ;;  %1402 = vmatpush.bf16.msra.mxu2 %v3583_v2  ;;  %v3590_v7 = vld [vmem:[#allocation5 + $0xf0] sm:$0xff]  ;;  %v3581_v10 = vld [vmem:[#allocation5 + $0xa8] sm:$0xff] }
  0x13   :  { %1491 = vmatpush.bf16.msra.mxu3 %v3591_v3  ;;  %v3589_v11 = vld [vmem:[#allocation5 + $0xe8] sm:$0xff]  ;;  %v3564_v12 = vld [vmem:[#allocation5 + $0x20] sm:$0xff]  ;;  %v3563_v16 = vld [vmem:[#allocation5 + $0x18] sm:$0xff] }
  0x14   :  { %1225 = vmatpush.bf16.msra.mxu0 %v3566_v4  ;;  %v3572_v13 = vld [vmem:[#allocation5 + $0x60] sm:$0xff]  ;;  %v3571_v17 = vld [vmem:[#allocation5 + $0x58] sm:$0xff]  ;;  %v3562_v20 = vld [vmem:[#allocation5 + $0x10] sm:$0xff] }
  0x15   :  { %1314 = vmatpush.bf16.msra.mxu1 %v3574_v5  ;;  %v3580_v14 = vld [vmem:[#allocation5 + $0xa0] sm:$0xff]  ;;  %v3579_v18 = vld [vmem:[#allocation5 + $0x98] sm:$0xff]  ;;  %v3570_v21 = vld [vmem:[#allocation5 + $0x50] sm:$0xff] }
  0x16   :  { %1403 = vmatpush.bf16.msra.mxu2 %v3582_v6  ;;  %v3588_v15 = vld [vmem:[#allocation5 + $0xe0] sm:$0xff]  ;;  %v3587_v19 = vld [vmem:[#allocation5 + $0xd8] sm:$0xff]  ;;  %v3578_v22 = vld [vmem:[#allocation5 + $0x90] sm:$0xff] }
  0x17   :  { %1492 = vmatpush.bf16.msra.mxu3 %v3590_v7  ;;  %v3586_v23 = vld [vmem:[#allocation5 + $0xd0] sm:$0xff]  ;;  %v3561_v24 = vld [vmem:[#allocation5 + $0x8] sm:$0xff]  ;;  %v3560_v28 = vld [vmem:[#allocation5] sm:$0xff] }
  0x18   :  { %1226 = vmatpush.bf16.msra.mxu0 %v3565_v8  ;;  %v3569_v25 = vld [vmem:[#allocation5 + $0x48] sm:$0xff]  ;;  %v3568_v29 = vld [vmem:[#allocation5 + $0x40] sm:$0xff]  ;;  %v3451_v33 = vld [vmem:[#allocation2 + $0x18] sm:$0xf0] }
  0x19   :  { %1315 = vmatpush.bf16.msra.mxu1 %v3573_v9  ;;  %v3577_v26 = vld [vmem:[#allocation5 + $0x88] sm:$0xff]  ;;  %v3576_v30 = vld [vmem:[#allocation5 + $0x80] sm:$0xff]  ;;  %v3615_v40 = vld [vmem:[#allocation5 + $0x1b8] sm:$0xff] }
  0x1a   :  { %1404 = vmatpush.bf16.msra.mxu2 %v3581_v10  ;;  %v3585_v27 = vld [vmem:[#allocation5 + $0xc8] sm:$0xff]  ;;  %v3584_v31 = vld [vmem:[#allocation5 + $0xc0] sm:$0xff]  ;;  %v3599_v41 = vld [vmem:[#allocation5 + $0x138] sm:$0xff] }
  0x1b   :  { %1493 = vmatpush.bf16.msra.mxu3 %v3589_v11  ;;  %v2714_v32 = vld [vmem:[#allocation2] sm:$0xf]  ;;  %v3448_v34 = vld [vmem:[#allocation2 + $0x4] sm:$0xf]  ;;  %v2722_v36 = vld [vmem:[#allocation2 + $0x8] sm:$0xf] }
  0x1c   :  { %1227 = vmatpush.bf16.msra.mxu0 %v3564_v12  ;;  %v2716_v35 = vld [vmem:[#allocation2 + $0x1c] sm:$0xf0]  ;;  %v3452_v37 = vld [vmem:[#allocation2 + $0x20] sm:$0xf0]  ;;  %v3449_v38 = vld [vmem:[#allocation2 + $0xc] sm:$0xf]  ;;  %v2715_v42 = vor.u32 %v3451_v33, %v2714_v32 }
  0x1d   :  { %1316 = vmatpush.bf16.msra.mxu1 %v3572_v13  ;;  %v2724_v39 = vld [vmem:[#allocation2 + $0x24] sm:$0xf0]  ;;  %v2719_v43 = vor.u32 %v3448_v34, %v2716_v35  ;;  %v2723_v44 = vor.u32 %v3452_v37, %v2722_v36  ;;  %v3607_v46 = vld [vmem:[#allocation5 + $0x178] sm:$0xff]  ;;  %v3614_v47 = vld [vmem:[#allocation5 + $0x1b0] sm:$0xff] }
  0x1e   :  { %1405 = vmatpush.bf16.msra.mxu2 %v3580_v14  ;;  %v2727_v45 = vor.u32 %v3449_v38, %v2724_v39  ;;  %v3598_v48 = vld [vmem:[#allocation5 + $0x130] sm:$0xff]  ;;  %v2742_v50 = vld [vmem:[#allocation2 + $0x38] sm:$0xf]  ;;  %v3455_v52 = vld [vmem:[#allocation2 + $0x3c] sm:$0xf] }
  0x1f   :  { %1494 = vmatpush.bf16.msra.mxu3 %v3588_v15  ;;  %v3606_v49 = vld [vmem:[#allocation5 + $0x170] sm:$0xff]  ;;  %v2744_v53 = vld [vmem:[#allocation2 + $0x54] sm:$0xf0]  ;;  %v2750_v54 = vld [vmem:[#allocation2 + $0x40] sm:$0xf] }
  0x20   :  { %1228 = vmatpush.bf16.msra.mxu0 %v3563_v16  ;;  %v3458_v51 = vld [vmem:[#allocation2 + $0x50] sm:$0xf0]  ;;  %v3459_v55 = vld [vmem:[#allocation2 + $0x58] sm:$0xf0]  ;;  %v3456_v56 = vld [vmem:[#allocation2 + $0x44] sm:$0xf]  ;;  %v2747_v59 = vor.u32 %v3455_v52, %v2744_v53 }
  0x21   :  { %1317 = vmatpush.bf16.msra.mxu1 %v3571_v17  ;;  %v2752_v57 = vld [vmem:[#allocation2 + $0x5c] sm:$0xf0]  ;;  %v2743_v58 = vor.u32 %v3458_v51, %v2742_v50  ;;  %v2751_v60 = vor.u32 %v3459_v55, %v2750_v54  ;;  %v2770_v62 = vld [vmem:[#allocation2 + $0x70] sm:$0xf]  ;;  %v3465_v63 = vld [vmem:[#allocation2 + $0x88] sm:$0xf0] }
  0x22   :  { %1406 = vmatpush.bf16.msra.mxu2 %v3579_v18  ;;  %v2755_v61 = vor.u32 %v3456_v56, %v2752_v57  ;;  %v3462_v0 = vld [vmem:[#allocation2 + $0x74] sm:$0xf]  ;;  %v2772_v1 = vld [vmem:[#allocation2 + $0x8c] sm:$0xf0]  ;;  %v2778_v2 = vld [vmem:[#allocation2 + $0x78] sm:$0xf]  ;;  %v2771_v6 = vor.u32 %v3465_v63, %v2770_v62 }
  0x23   :  { %1495 = vmatpush.bf16.msra.mxu3 %v3587_v19  ;;  %v3466_v3 = vld [vmem:[#allocation2 + $0x90] sm:$0xf0]  ;;  %v3463_v4 = vld [vmem:[#allocation2 + $0x7c] sm:$0xf]  ;;  %v2780_v5 = vld [vmem:[#allocation2 + $0x94] sm:$0xf0]  ;;  %v2775_v7 = vor.u32 %v3462_v0, %v2772_v1 }
  0x24   :  { %1229 = vmatpush.bf16.msra.mxu0 %v3562_v20  ;;  %v2779_v8 = vor.u32 %v3466_v3, %v2778_v2  ;;  %v2783_v9 = vor.u32 %v3463_v4, %v2780_v5  ;;  %v3613_v10 = vld [vmem:[#allocation5 + $0x1a8] sm:$0xff]  ;;  %v3472_v14 = vld [vmem:[#allocation2 + $0xc0] sm:$0xf0]  ;;  %v2806_v17 = vld [vmem:[#allocation2 + $0xb0] sm:$0xf] }
  0x25   :  { %1318 = vmatpush.bf16.msra.mxu1 %v3570_v21  ;;  %v3597_v11 = vld [vmem:[#allocation5 + $0x128] sm:$0xff]  ;;  %v3470_v19 = vld [vmem:[#allocation2 + $0xb4] sm:$0xf]  ;;  %v2808_v20 = vld [vmem:[#allocation2 + $0xcc] sm:$0xf0] }
  0x26   :  { %1407 = vmatpush.bf16.msra.mxu2 %v3578_v22  ;;  %v3605_v12 = vld [vmem:[#allocation5 + $0x168] sm:$0xff]  ;;  %v3612_v37 = vld [vmem:[#allocation5 + $0x1a0] sm:$0xff]  ;;  %v2882_v52 = vld [vmem:[#allocation2 + $0x150] sm:$0xf] }
  0x27   :  { %1496 = vmatpush.bf16.msra.mxu3 %v3586_v23  ;;  %v2798_v13 = vld [vmem:[#allocation2 + $0xa8] sm:$0xf]  ;;  %v3469_v15 = vld [vmem:[#allocation2 + $0xac] sm:$0xf]  ;;  %v3596_v38 = vld [vmem:[#allocation5 + $0x120] sm:$0xff] }
  0x28   :  { %1230 = vmatpush.bf16.msra.mxu0 %v3561_v24  ;;  %v2800_v16 = vld [vmem:[#allocation2 + $0xc4] sm:$0xf0]  ;;  %v3473_v18 = vld [vmem:[#allocation2 + $0xc8] sm:$0xf0]  ;;  %v2799_v21 = vor.u32 %v3472_v14, %v2798_v13  ;;  %v2811_v24 = vor.u32 %v3470_v19, %v2808_v20  ;;  %v3604_v39 = vld [vmem:[#allocation5 + $0x160] sm:$0xff] }
  0x29   :  { %1319 = vmatpush.bf16.msra.mxu1 %v3569_v25  ;;  %v2803_v22 = vor.u32 %v3469_v15, %v2800_v16  ;;  %v2807_v23 = vor.u32 %v3473_v18, %v2806_v17  ;;  %v2826_v25 = vld [vmem:[#allocation2 + $0xe0] sm:$0xf]  ;;  %v2836_v32 = vld [vmem:[#allocation2 + $0x104] sm:$0xf0]  ;;  %v3493_v53 = vld [vmem:[#allocation2 + $0x168] sm:$0xf0] }
  0x2a   :  { %1408 = vmatpush.bf16.msra.mxu2 %v3577_v26  ;;  %v3479_v26 = vld [vmem:[#allocation2 + $0xf8] sm:$0xf0]  ;;  %v3490_v54 = vld [vmem:[#allocation2 + $0x154] sm:$0xf]  ;;  %v2884_v55 = vld [vmem:[#allocation2 + $0x16c] sm:$0xf0] }
  0x2b   :  { %1497 = vmatpush.bf16.msra.mxu3 %v3585_v27  ;;  %v3476_v27 = vld [vmem:[#allocation2 + $0xe4] sm:$0xf]  ;;  %v2827_v33 = vor.u32 %v3479_v26, %v2826_v25  ;;  %v2890_v56 = vld [vmem:[#allocation2 + $0x158] sm:$0xf]  ;;  %v3494_v57 = vld [vmem:[#allocation2 + $0x170] sm:$0xf0] }
  0x2c   :  { %1231 = vmatpush.bf16.msra.mxu0 %v3560_v28  ;;  %v2828_v28 = vld [vmem:[#allocation2 + $0xfc] sm:$0xf0]  ;;  %v2891_v62 = vor.u32 %v3494_v57, %v2890_v56  ;;  %v3611_v0 = vld [vmem:[#allocation5 + $0x198] sm:$0xff]  ;;  %v2910_v3 = vld [vmem:[#allocation2 + $0x188] sm:$0xf] }
  0x2d   :  { %1320 = vmatpush.bf16.msra.mxu1 %v3568_v29  ;;  %v2834_v29 = vld [vmem:[#allocation2 + $0xe8] sm:$0xf]  ;;  %v2831_v34 = vor.u32 %v3476_v27, %v2828_v28  ;;  %v3595_v1 = vld [vmem:[#allocation5 + $0x118] sm:$0xff]  ;;  %v3500_v4 = vld [vmem:[#allocation2 + $0x1a0] sm:$0xf0] }
  0x2e   :  { %1409 = vmatpush.bf16.msra.mxu2 %v3576_v30  ;;  %v3480_v30 = vld [vmem:[#allocation2 + $0x100] sm:$0xf0]  ;;  %v3603_v2 = vld [vmem:[#allocation5 + $0x158] sm:$0xff]  ;;  %v3497_v5 = vld [vmem:[#allocation2 + $0x18c] sm:$0xf] }
  0x2f   :  { %1498 = vmatpush.bf16.msra.mxu3 %v3584_v31  ;;  %1232 = vmatmul.bf16.vlgmr.msra.gmra.mxu0 %v2715_v42  ;;  %v3477_v31 = vld [vmem:[#allocation2 + $0xec] sm:$0xf]  ;;  %v2835_v35 = vor.u32 %v3480_v30, %v2834_v29  ;;  %v3483_v42 = vld [vmem:[#allocation2 + $0x11c] sm:$0xf]  ;;  %v3919_v16 = vld [vmem:[%s4160_s2] ss:$0 sm:$0xff] }
  0x30   :  { %1580 = vmatpush.bf16.msrb.mxu0 %v3599_v41  ;;  %1321 = vmatmul.bf16.vlgmr.msra.gmra.mxu1 %v2719_v43  ;;  %v2839_v36 = vor.u32 %v3477_v31, %v2836_v32  ;;  %v3486_v41 = vld [vmem:[#allocation2 + $0x130] sm:$0xf0]  ;;  %v2856_v43 = vld [vmem:[#allocation2 + $0x134] sm:$0xf0]  ;;  %v2938_v17 = vld [vmem:[#allocation2 + $0x1c0] sm:$0xf] }
  0x31   :  { %1410 = vmatmul.bf16.vlgmr.msra.gmra.mxu2 %v2723_v44  ;;  %1669 = vmatpush.bf16.msrb.mxu1 %v3607_v46  ;;  %v2862_v44 = vld [vmem:[#allocation2 + $0x120] sm:$0xf]  ;;  %v3484_v46 = vld [vmem:[#allocation2 + $0x124] sm:$0xf]  ;;  %v3623_v15 = vld [vmem:[#allocation7 + $0x38] sm:$0xff] }
  0x32   :  { %1758 = vmatpush.bf16.msrb.mxu2 %v3615_v40  ;;  %1499 = vmatmul.bf16.vlgmr.msra.gmra.mxu3 %v2727_v45  ;;  %v2854_v40 = vld [vmem:[#allocation2 + $0x118] sm:$0xf]  ;;  %v3487_v45 = vld [vmem:[#allocation2 + $0x138] sm:$0xf0]  ;;  %v3504_v19 = vld [vmem:[#allocation2 + $0x1c4] sm:$0xf] }
  0x33   :  { %v2863_v50 = vor.u32 %v3487_v45, %v2862_v44  ;;  %1963 = vmatpush.bf16.msrb.mxu3 %v3623_v15  ;;  %v3507_v18 = vld [vmem:[#allocation2 + $0x1d8] sm:$0xf0]  ;;  %v2940_v20 = vld [vmem:[#allocation2 + $0x1dc] sm:$0xf0]  ;;  %v2966_v44 = vld [vmem:[#allocation2 + $0x1f8] sm:$0xf] }
  0x34   :  { %1581 = vmatpush.bf16.msrb.mxu0 %v3598_v48  ;;  %v2855_v48 = vor.u32 %v3486_v41, %v2854_v40  ;;  %v2939_v25 = vor.u32 %v3507_v18, %v2938_v17  ;;  %v2943_v26 = vor.u32 %v3504_v19, %v2940_v20  ;;  %v3602_v40 = vld [vmem:[#allocation5 + $0x150] sm:$0xff]  ;;  %v3519_v15 = vld [vmem:[#allocation2 + $0x23c] sm:$0xf]  ;;  %v3004_v17 = vld [vmem:[#allocation2 + $0x254] sm:$0xf0] }
  0x35   :  { %1670 = vmatpush.bf16.msrb.mxu1 %v3606_v49  ;;  %v2859_v49 = vor.u32 %v3483_v42, %v2856_v43  ;;  %v3514_v45 = vld [vmem:[#allocation2 + $0x210] sm:$0xf0] }
  0x36   :  { %1759 = vmatpush.bf16.msrb.mxu2 %v3614_v47  ;;  %v2864_v47 = vld [vmem:[#allocation2 + $0x13c] sm:$0xf0] }
  0x37   :  { %v2867_v51 = vor.u32 %v3484_v46, %v2864_v47  ;;  %v3511_v46 = vld [vmem:[#allocation2 + $0x1fc] sm:$0xf]  ;;  %v2968_v47 = vld [vmem:[#allocation2 + $0x214] sm:$0xf0] }
  0x38   :  { %1582 = vmatpush.bf16.msrb.mxu0 %v3597_v11  ;;  %v2911_v11 = vor.u32 %v3500_v4, %v2910_v3 }
  0x39   :  { %1671 = vmatpush.bf16.msrb.mxu1 %v3605_v12 }
  0x3a   :  { %1760 = vmatpush.bf16.msrb.mxu2 %v3613_v10  ;;  %v2920_v10 = vld [vmem:[#allocation2 + $0x1ac] sm:$0xf0] }
  0x3c   :  { %1583 = vmatpush.bf16.msrb.mxu0 %v3596_v38 }
  0x3d   :  { %1672 = vmatpush.bf16.msrb.mxu1 %v3604_v39 }
  0x3e   :  { %1761 = vmatpush.bf16.msrb.mxu2 %v3612_v37 }
  0x3f   :  { %1237 = vmatmul.bf16.gmra.mxu0 %v2743_v58  ;;  %v3491_v58 = vld [vmem:[#allocation2 + $0x15c] sm:$0xf] }
  0x40   :  { %1326 = vmatmul.bf16.gmra.mxu1 %v2747_v59  ;;  %v2892_v59 = vld [vmem:[#allocation2 + $0x174] sm:$0xf0]  ;;  %1584 = vmatpush.bf16.msrb.mxu0 %v3595_v1 }
  0x41   :  { %1415 = vmatmul.bf16.gmra.mxu2 %v2751_v60  ;;  %v2883_v60 = vor.u32 %v3493_v53, %v2882_v52  ;;  %v2895_v63 = vor.u32 %v3491_v58, %v2892_v59  ;;  %1673 = vmatpush.bf16.msrb.mxu1 %v3603_v2 }
  0x42   :  { %1504 = vmatmul.bf16.gmra.mxu3 %v2755_v61  ;;  %v2887_v61 = vor.u32 %v3490_v54, %v2884_v55  ;;  %1762 = vmatpush.bf16.msrb.mxu2 %v3611_v0  ;;  %v2967_v54 = vor.u32 %v3514_v45, %v2966_v44  ;;  %v2971_v55 = vor.u32 %v3511_v46, %v2968_v47  ;;  %v3622_v0 = vld [vmem:[#allocation7 + $0x30] sm:$0xff]  ;;  %v3525_v44 = vld [vmem:[#allocation2 + $0x26c] sm:$0xf]  ;;  %v3024_v45 = vld [vmem:[#allocation2 + $0x284] sm:$0xf0] }
  0x43   :  { %1964 = vmatpush.bf16.msrb.mxu3 %v3622_v0  ;;  %v3030_v46 = vld [vmem:[#allocation2 + $0x270] sm:$0xf]  ;;  %v3529_v47 = vld [vmem:[#allocation2 + $0x288] sm:$0xf0] }
  0x45   :  { %1674 = vmatpush.bf16.msrb.mxu1 %v3602_v40 }
  0x4f   :  { %1242 = vmatmul.bf16.gmra.mxu0 %v2771_v6  ;;  %v2912_v6 = vld [vmem:[#allocation2 + $0x1a4] sm:$0xf0] }
  0x50   :  { %1331 = vmatmul.bf16.gmra.mxu1 %v2775_v7  ;;  %v2918_v7 = vld [vmem:[#allocation2 + $0x190] sm:$0xf]  ;;  %v2915_v12 = vor.u32 %v3497_v5, %v2912_v6 }
  0x51   :  { %1420 = vmatmul.bf16.gmra.mxu2 %v2779_v8  ;;  %v3501_v8 = vld [vmem:[#allocation2 + $0x1a8] sm:$0xf0] }
  0x52   :  { %1509 = vmatmul.bf16.gmra.mxu3 %v2783_v9  ;;  %v3498_v9 = vld [vmem:[#allocation2 + $0x194] sm:$0xf]  ;;  %v2919_v13 = vor.u32 %v3501_v8, %v2918_v7 }
  0x53   :  { %v2923_v14 = vor.u32 %v3498_v9, %v2920_v10  ;;  %v2994_v9 = vld [vmem:[#allocation2 + $0x230] sm:$0xf]  ;;  %v3521_v10 = vld [vmem:[#allocation2 + $0x248] sm:$0xf0] }
  0x54   :  { %v2995_v20 = vor.u32 %v3521_v10, %v2994_v9  ;;  %v3050_v9 = vld [vmem:[#allocation2 + $0x2a0] sm:$0xf]  ;;  %v3535_v10 = vld [vmem:[#allocation2 + $0x2b8] sm:$0xf0] }
  0x5f   :  { %1247 = vmatmul.bf16.gmra.mxu0 %v2799_v21  ;;  %v2946_v21 = vld [vmem:[#allocation2 + $0x1c8] sm:$0xf] }
  0x60   :  { %1336 = vmatmul.bf16.gmra.mxu1 %v2803_v22  ;;  %v3508_v22 = vld [vmem:[#allocation2 + $0x1e0] sm:$0xf0] }
  0x61   :  { %1425 = vmatmul.bf16.gmra.mxu2 %v2807_v23  ;;  %v3505_v23 = vld [vmem:[#allocation2 + $0x1cc] sm:$0xf]  ;;  %v2947_v29 = vor.u32 %v3508_v22, %v2946_v21 }
  0x62   :  { %1514 = vmatmul.bf16.gmra.mxu3 %v2811_v24  ;;  %v2948_v24 = vld [vmem:[#allocation2 + $0x1e4] sm:$0xf0] }
  0x63   :  { %v2951_v30 = vor.u32 %v3505_v23, %v2948_v24 }
  0x6f   :  { %1252 = vmatmul.bf16.gmra.mxu0 %v2827_v33  ;;  %v3610_v33 = vld [vmem:[#allocation5 + $0x190] sm:$0xff] }
  0x70   :  { %1341 = vmatmul.bf16.gmra.mxu1 %v2831_v34  ;;  %v3594_v34 = vld [vmem:[#allocation5 + $0x110] sm:$0xff]  ;;  %1763 = vmatpush.bf16.msrb.mxu2 %v3610_v33 }
  0x71   :  { %1430 = vmatmul.bf16.gmra.mxu2 %v2835_v35  ;;  %1585 = vmatpush.bf16.msrb.mxu0 %v3594_v34 }
  0x72   :  { %1519 = vmatmul.bf16.gmra.mxu3 %v2839_v36 }
  0x7f   :  { %1257 = vmatmul.bf16.gmra.mxu0 %v2855_v48  ;;  %v2974_v48 = vld [vmem:[#allocation2 + $0x200] sm:$0xf] }
  0x80   :  { %1346 = vmatmul.bf16.gmra.mxu1 %v2859_v49  ;;  %v3515_v49 = vld [vmem:[#allocation2 + $0x218] sm:$0xf0] }
  0x81   :  { %1435 = vmatmul.bf16.gmra.mxu2 %v2863_v50  ;;  %v3512_v50 = vld [vmem:[#allocation2 + $0x204] sm:$0xf]  ;;  %v2975_v59 = vor.u32 %v3515_v49, %v2974_v48  ;;  %v3526_v48 = vld [vmem:[#allocation2 + $0x274] sm:$0xf]  ;;  %v3032_v49 = vld [vmem:[#allocation2 + $0x28c] sm:$0xf0] }
  0x82   :  { %1524 = vmatmul.bf16.gmra.mxu3 %v2867_v51  ;;  %v2976_v51 = vld [vmem:[#allocation2 + $0x21c] sm:$0xf0] }
  0x8f   :  { %1262 = vmatmul.bf16.gmra.mxu0 %v2883_v60  ;;  %v2979_v60 = vor.u32 %v3512_v50, %v2976_v51 }
  0x90   :  { %1351 = vmatmul.bf16.gmra.mxu1 %v2887_v61 }
  0x91   :  { %1440 = vmatmul.bf16.gmra.mxu2 %v2891_v62 }
  0x92   :  { %1529 = vmatmul.bf16.gmra.mxu3 %v2895_v63 }
  0x9f   :  { %1267 = vmatmul.bf16.gmra.mxu0 %v2911_v11  ;;  %v3518_v11 = vld [vmem:[#allocation2 + $0x234] sm:$0xf] }
  0xa0   :  { %1356 = vmatmul.bf16.gmra.mxu1 %v2915_v12  ;;  %v2996_v12 = vld [vmem:[#allocation2 + $0x24c] sm:$0xf0] }
  0xa1   :  { %1445 = vmatmul.bf16.gmra.mxu2 %v2919_v13  ;;  %v3002_v13 = vld [vmem:[#allocation2 + $0x238] sm:$0xf]  ;;  %v2999_v21 = vor.u32 %v3518_v11, %v2996_v12  ;;  %v3532_v11 = vld [vmem:[#allocation2 + $0x2a4] sm:$0xf]  ;;  %v3052_v12 = vld [vmem:[#allocation2 + $0x2bc] sm:$0xf0] }
  0xa2   :  { %1534 = vmatmul.bf16.gmra.mxu3 %v2923_v14  ;;  %v3522_v14 = vld [vmem:[#allocation2 + $0x250] sm:$0xf0] }
  0xac   :  { %v1233_v27 = vpop.f32.mrf.mxu0 }
  0xad   :  { %v1322_v28 = vpop.f32.mrf.mxu1  ;;  %v1234_v31 = vadd.f32 %v3919_v16, %v1233_v27 }
  0xaf   :  { %v1323_v32 = vadd.f32 %v1322_v28, %v1234_v31  ;;  %1272 = vmatmul.bf16.gmra.mxu0 %v2939_v25  ;;  %v3003_v25 = vor.u32 %v3522_v14, %v3002_v13  ;;  %v3593_v31 = vld [vmem:[#allocation5 + $0x108] sm:$0xff]  ;;  %v3536_v14 = vld [vmem:[#allocation2 + $0x2c0] sm:$0xf0] }
  0xb0   :  { %1361 = vmatmul.bf16.gmra.mxu1 %v2943_v26  ;;  %v3007_v26 = vor.u32 %v3519_v15, %v3004_v17  ;;  %1586 = vmatpush.bf16.msrb.mxu0 %v3593_v31  ;;  %v3058_v13 = vld [vmem:[#allocation2 + $0x2a8] sm:$0xf]  ;;  %v3533_v15 = vld [vmem:[#allocation2 + $0x2ac] sm:$0xf]  ;;  %v3608_v31 = vld [vmem:[#allocation5 + $0x180] sm:$0xff] }
  0xb1   :  { %1450 = vmatmul.bf16.gmra.mxu2 %v2947_v29  ;;  %v3060_v17 = vld [vmem:[#allocation2 + $0x2c4] sm:$0xf0] }
  0xb2   :  { %1539 = vmatmul.bf16.gmra.mxu3 %v2951_v30  ;;  %v3609_v30 = vld [vmem:[#allocation5 + $0x188] sm:$0xff] }
  0xb3   :  { %1764 = vmatpush.bf16.msrb.mxu2 %v3609_v30 }
  0xb4   :  { %v1411_v35 = vpop.f32.mrf.mxu2  ;;  %v1235_v38 = vpop.f32.mrf.mxu0 }
  0xb5   :  { %v1500_v36 = vpop.f32.mrf.mxu3  ;;  %v1412_v37 = vadd.f32 %v1411_v35, %v1323_v32  ;;  %v1324_v39 = vpop.f32.mrf.mxu1  ;;  %v1236_v41 = vadd.f32 %v3919_v16, %v1235_v38 }
  0xb7   :  { %v3923_v42 = vadd.f32 %v1500_v36, %v1412_v37  ;;  %v1325_v43 = vadd.f32 %v1324_v39, %v1236_v41  ;;  %v3601_v37 = vld [vmem:[#allocation5 + $0x148] sm:$0xff]  ;;  %1765 = vmatpush.bf16.msrb.mxu2 %v3608_v31 }
  0xb8   :  { %1675 = vmatpush.bf16.msrb.mxu1 %v3601_v37  ;;  %v3022_v41 = vld [vmem:[#allocation2 + $0x268] sm:$0xf] }
  0xbc   :  { %v1413_v52 = vpop.f32.mrf.mxu2  ;;  %v1238_v57 = vpop.f32.mrf.mxu0 }
  0xbd   :  { %v1502_v53 = vpop.f32.mrf.mxu3  ;;  %v1414_v56 = vadd.f32 %v1413_v52, %v1325_v43  ;;  %v1327_v58 = vpop.f32.mrf.mxu1  ;;  %v1239_v61 = vadd.f32 %v3919_v16, %v1238_v57  ;;  %v3528_v43 = vld [vmem:[#allocation2 + $0x280] sm:$0xf0]  ;;  %v3031_v57 = vor.u32 %v3529_v47, %v3030_v46  ;;  %v3539_v46 = vld [vmem:[#allocation2 + $0x2dc] sm:$0xf]  ;;  %v3080_v47 = vld [vmem:[#allocation2 + $0x2f4] sm:$0xf0] }
  0xbe   :  { %v3023_v52 = vor.u32 %v3528_v43, %v3022_v41 }
  0xbf   :  { %v3926_v62 = vadd.f32 %v1502_v53, %v1414_v56  ;;  %v1328_v63 = vadd.f32 %v1327_v58, %v1239_v61  ;;  %1277 = vmatmul.bf16.gmra.mxu0 %v2967_v54  ;;  %v3027_v53 = vor.u32 %v3525_v44, %v3024_v45  ;;  %v3035_v58 = vor.u32 %v3526_v48, %v3032_v49  ;;  %v3078_v44 = vld [vmem:[#allocation2 + $0x2d8] sm:$0xf]  ;;  %v3542_v45 = vld [vmem:[#allocation2 + $0x2f0] sm:$0xf0]  ;;  %v3086_v48 = vld [vmem:[#allocation2 + $0x2e0] sm:$0xf] }
  0xc0   :  { %1366 = vmatmul.bf16.gmra.mxu1 %v2971_v55  ;;  %v3543_v49 = vld [vmem:[#allocation2 + $0x2f8] sm:$0xf0] }
  0xc1   :  { %1455 = vmatmul.bf16.gmra.mxu2 %v2975_v59 }
  0xc2   :  { %1544 = vmatmul.bf16.gmra.mxu3 %v2979_v60 }
  0xc4   :  { %v1416_v1 = vpop.f32.mrf.mxu2  ;;  %v1240_v4 = vpop.f32.mrf.mxu0 }
  0xc5   :  { %v1505_v2 = vpop.f32.mrf.mxu3  ;;  %v1417_v3 = vadd.f32 %v1416_v1, %v1328_v63  ;;  %v1329_v5 = vpop.f32.mrf.mxu1  ;;  %v1241_v6 = vadd.f32 %v3919_v16, %v1240_v4  ;;  %v3621_v63 = vld [vmem:[#allocation7 + $0x28] sm:$0xff] }
  0xc6   :  { %1965 = vmatpush.bf16.msrb.mxu3 %v3621_v63 }
  0xc7   :  { %v3929_v7 = vadd.f32 %v1505_v2, %v1417_v3  ;;  %v1330_v8 = vadd.f32 %v1329_v5, %v1241_v6 }
  0xcc   :  { %v1418_v18 = vpop.f32.mrf.mxu2  ;;  %v1243_v23 = vpop.f32.mrf.mxu0 }
  0xcd   :  { %v1507_v19 = vpop.f32.mrf.mxu3  ;;  %v1419_v22 = vadd.f32 %v1418_v18, %v1330_v8  ;;  %v1332_v24 = vpop.f32.mrf.mxu1  ;;  %v1244_v27 = vadd.f32 %v3919_v16, %v1243_v23 }
  0xcf   :  { %v3932_v28 = vadd.f32 %v1507_v19, %v1419_v22  ;;  %v1333_v29 = vadd.f32 %v1332_v24, %v1244_v27  ;;  %1282 = vmatmul.bf16.gmra.mxu0 %v2995_v20  ;;  %v3051_v20 = vor.u32 %v3535_v10, %v3050_v9 }
  0xd0   :  { %1371 = vmatmul.bf16.gmra.mxu1 %v2999_v21  ;;  %v3055_v21 = vor.u32 %v3532_v11, %v3052_v12  ;;  %v3106_v12 = vld [vmem:[#allocation2 + $0x310] sm:$0xf] }
  0xd1   :  { %1460 = vmatmul.bf16.gmra.mxu2 %v3003_v25  ;;  %v3059_v25 = vor.u32 %v3536_v14, %v3058_v13  ;;  %v3549_v13 = vld [vmem:[#allocation2 + $0x328] sm:$0xf0]  ;;  %v3546_v14 = vld [vmem:[#allocation2 + $0x314] sm:$0xf] }
  0xd2   :  { %1549 = vmatmul.bf16.gmra.mxu3 %v3007_v26  ;;  %v3063_v26 = vor.u32 %v3533_v15, %v3060_v17  ;;  %v3108_v15 = vld [vmem:[#allocation2 + $0x32c] sm:$0xf0]  ;;  %v3114_v17 = vld [vmem:[#allocation2 + $0x318] sm:$0xf] }
  0xd4   :  { %v1421_v32 = vpop.f32.mrf.mxu2  ;;  %v1245_v35 = vpop.f32.mrf.mxu0 }
  0xd5   :  { %v1510_v33 = vpop.f32.mrf.mxu3  ;;  %v1422_v34 = vadd.f32 %v1421_v32, %v1333_v29  ;;  %v1334_v36 = vpop.f32.mrf.mxu1  ;;  %v1246_v38 = vadd.f32 %v3919_v16, %v1245_v35  ;;  %v3592_v32 = vld [vmem:[#allocation5 + $0x100] sm:$0xff] }
  0xd6   :  { %1587 = vmatpush.bf16.msrb.mxu0 %v3592_v32 }
  0xd7   :  { %v3935_v39 = vadd.f32 %v1510_v33, %v1422_v34  ;;  %v1335_v40 = vadd.f32 %v1334_v36, %v1246_v38  ;;  %v3600_v38 = vld [vmem:[#allocation5 + $0x140] sm:$0xff] }
  0xd8   :  { %1676 = vmatpush.bf16.msrb.mxu1 %v3600_v38 }
  0xdc   :  { %v1423_v50 = vpop.f32.mrf.mxu2  ;;  %v1248_v55 = vpop.f32.mrf.mxu0 }
  0xdd   :  { %v1512_v51 = vpop.f32.mrf.mxu3  ;;  %v1424_v54 = vadd.f32 %v1423_v50, %v1335_v40  ;;  %v1337_v56 = vpop.f32.mrf.mxu1  ;;  %v1249_v59 = vadd.f32 %v3919_v16, %v1248_v55  ;;  %v3540_v50 = vld [vmem:[#allocation2 + $0x2e4] sm:$0xf]  ;;  %v3083_v55 = vor.u32 %v3539_v46, %v3080_v47  ;;  %v3553_v47 = vld [vmem:[#allocation2 + $0x34c] sm:$0xf] }
  0xde   :  { %v3556_v46 = vld [vmem:[#allocation2 + $0x360] sm:$0xf0] }
  0xdf   :  { %v3938_v60 = vadd.f32 %v1512_v51, %v1424_v54  ;;  %v1338_v61 = vadd.f32 %v1337_v56, %v1249_v59  ;;  %1287 = vmatmul.bf16.gmra.mxu0 %v3023_v52  ;;  %v3088_v51 = vld [vmem:[#allocation2 + $0x2fc] sm:$0xf0]  ;;  %v3079_v54 = vor.u32 %v3542_v45, %v3078_v44  ;;  %v3087_v59 = vor.u32 %v3543_v49, %v3086_v48  ;;  %v3134_v45 = vld [vmem:[#allocation2 + $0x348] sm:$0xf]  ;;  %v3142_v49 = vld [vmem:[#allocation2 + $0x350] sm:$0xf] }
  0xe0   :  { %1376 = vmatmul.bf16.gmra.mxu1 %v3027_v53  ;;  %v3136_v48 = vld [vmem:[#allocation2 + $0x364] sm:$0xf0] }
  0xe1   :  { %1465 = vmatmul.bf16.gmra.mxu2 %v3031_v57 }
  0xe2   :  { %1554 = vmatmul.bf16.gmra.mxu3 %v3035_v58 }
  0xe4   :  { %v1426_v0 = vpop.f32.mrf.mxu2  ;;  %v1250_v3 = vpop.f32.mrf.mxu0 }
  0xe5   :  { %v1515_v1 = vpop.f32.mrf.mxu3  ;;  %v1427_v2 = vadd.f32 %v1426_v0, %v1338_v61  ;;  %v1339_v4 = vpop.f32.mrf.mxu1  ;;  %v1251_v5 = vadd.f32 %v3919_v16, %v1250_v3  ;;  %v3091_v61 = vor.u32 %v3540_v50, %v3088_v51  ;;  %v3557_v50 = vld [vmem:[#allocation2 + $0x368] sm:$0xf0]  ;;  %v3554_v51 = vld [vmem:[#allocation2 + $0x354] sm:$0xf] }
  0xe7   :  { %v3941_v6 = vadd.f32 %v1515_v1, %v1427_v2  ;;  %v1340_v8 = vadd.f32 %v1339_v4, %v1251_v5  ;;  %v3620_v1 = vld [vmem:[#allocation7 + $0x20] sm:$0xff] }
  0xe8   :  { %1966 = vmatpush.bf16.msrb.mxu3 %v3620_v1 }
  0xec   :  { %v1428_v18 = vpop.f32.mrf.mxu2  ;;  %v1253_v23 = vpop.f32.mrf.mxu0 }
  0xed   :  { %v1517_v19 = vpop.f32.mrf.mxu3  ;;  %v1429_v22 = vadd.f32 %v1428_v18, %v1340_v8  ;;  %v1342_v24 = vpop.f32.mrf.mxu1  ;;  %v1254_v27 = vadd.f32 %v3919_v16, %v1253_v23  ;;  %v3550_v18 = vld [vmem:[#allocation2 + $0x330] sm:$0xf0]  ;;  %v3107_v23 = vor.u32 %v3549_v13, %v3106_v12 }
  0xef   :  { %v3944_v29 = vadd.f32 %v1517_v19, %v1429_v22  ;;  %v1343_v30 = vadd.f32 %v1342_v24, %v1254_v27  ;;  %1292 = vmatmul.bf16.gmra.mxu0 %v3051_v20  ;;  %v3547_v19 = vld [vmem:[#allocation2 + $0x31c] sm:$0xf]  ;;  %v3116_v20 = vld [vmem:[#allocation2 + $0x334] sm:$0xf0]  ;;  %v3111_v24 = vor.u32 %v3546_v14, %v3108_v15 }
  0xf0   :  { %1381 = vmatmul.bf16.gmra.mxu1 %v3055_v21  ;;  %v3119_v31 = vor.u32 %v3547_v19, %v3116_v20  ;;  %v3450_v19 = vld [vmem:[#allocation2 + $0x14] sm:$0xf]  ;;  %v2732_v20 = vld [vmem:[#allocation2 + $0x2c] sm:$0xf0] }
  0xf1   :  { %1470 = vmatmul.bf16.gmra.mxu2 %v3059_v25 }
  0xf2   :  { %1559 = vmatmul.bf16.gmra.mxu3 %v3063_v26 }
  0xf4   :  { %v1431_v33 = vpop.f32.mrf.mxu2  ;;  %v1255_v36 = vpop.f32.mrf.mxu0 }
  0xf5   :  { %v1520_v34 = vpop.f32.mrf.mxu3  ;;  %v1432_v35 = vadd.f32 %v1431_v33, %v1343_v30  ;;  %v1344_v37 = vpop.f32.mrf.mxu1  ;;  %v1256_v40 = vadd.f32 %v3919_v16, %v1255_v36  ;;  %v3115_v30 = vor.u32 %v3550_v18, %v3114_v17  ;;  %v2730_v17 = vld [vmem:[#allocation2 + $0x10] sm:$0xf]  ;;  %v3453_v18 = vld [vmem:[#allocation2 + $0x28] sm:$0xf0] }
  0xf7   :  { %v3947_v41 = vadd.f32 %v1520_v34, %v1432_v35  ;;  %v1345_v43 = vadd.f32 %v1344_v37, %v1256_v40 }
  0xfc   :  { %v1433_v52 = vpop.f32.mrf.mxu2  ;;  %v1258_v57 = vpop.f32.mrf.mxu0 }
  0xfd   :  { %v3949_v53 = vpop.f32.mrf.mxu3  ;;  %v3951_v56 = vadd.f32 %v1433_v52, %v1345_v43  ;;  %v1347_v58 = vpop.f32.mrf.mxu1  ;;  %v1259_v63 = vadd.f32 %v3919_v16, %v1258_v57  ;;  %v3144_v52 = vld [vmem:[#allocation2 + $0x36c] sm:$0xf0]  ;;  %v3135_v57 = vor.u32 %v3556_v46, %v3134_v45 }
  0xfe   :  { %v3147_v1 = vor.u32 %v3554_v51, %v3144_v52  ;;  %v3457_v51 = vld [vmem:[#allocation2 + $0x4c] sm:$0xf]  ;;  %v2760_v52 = vld [vmem:[#allocation2 + $0x64] sm:$0xf0] }
  0xff   :  { %v1348_v0 = vadd.f32 %v1347_v58, %v1259_v63  ;;  %1297 = vmatmul.bf16.gmra.mxu0 %v3079_v54  ;;  %v3139_v58 = vor.u32 %v3553_v47, %v3136_v48 }
 0x100   :  { %1386 = vmatmul.bf16.gmra.mxu1 %v3083_v55 }
 0x101   :  { %1475 = vmatmul.bf16.gmra.mxu2 %v3087_v59 }
 0x102   :  { %1564 = vmatmul.bf16.gmra.mxu3 %v3091_v61 }
 0x104   :  { %v1436_v2 = vpop.f32.mrf.mxu2  ;;  %v1260_v5 = vpop.f32.mrf.mxu0 }
 0x105   :  { %v1525_v3 = vpop.f32.mrf.mxu3  ;;  %v1437_v4 = vadd.f32 %v1436_v2, %v1348_v0  ;;  %v1349_v8 = vpop.f32.mrf.mxu1  ;;  %v1261_v9 = vadd.f32 %v3919_v16, %v1260_v5  ;;  %v3143_v0 = vor.u32 %v3557_v50, %v3142_v49  ;;  %v2758_v49 = vld [vmem:[#allocation2 + $0x48] sm:$0xf]  ;;  %v3460_v50 = vld [vmem:[#allocation2 + $0x60] sm:$0xf0] }
 0x107   :  { %v3955_v10 = vadd.f32 %v1525_v3, %v1437_v4  ;;  %v1350_v11 = vadd.f32 %v1349_v8, %v1261_v9  ;;  %v3619_v4 = vld [vmem:[#allocation7 + $0x18] sm:$0xff] }
 0x108   :  { %1967 = vmatpush.bf16.msrb.mxu3 %v3619_v4 }
 0x10c   :  { %v1438_v21 = vpop.f32.mrf.mxu2  ;;  %v1263_v26 = vpop.f32.mrf.mxu0 }
 0x10d   :  { %v3957_v22 = vpop.f32.mrf.mxu3  ;;  %v3959_v25 = vadd.f32 %v1438_v21, %v1350_v11  ;;  %v1352_v27 = vpop.f32.mrf.mxu1  ;;  %v1264_v32 = vadd.f32 %v3919_v16, %v1263_v26  ;;  %v2738_v21 = vld [vmem:[#allocation2 + $0x18] sm:$0xf] }
 0x10f   :  { %v1353_v33 = vadd.f32 %v1352_v27, %v1264_v32  ;;  %1302 = vmatmul.bf16.gmra.mxu0 %v3107_v23  ;;  %v3454_v23 = vld [vmem:[#allocation2 + $0x30] sm:$0xf0]  ;;  %v2731_v27 = vor.u32 %v3453_v18, %v2730_v17 }
 0x110   :  { %1391 = vmatmul.bf16.gmra.mxu1 %v3111_v24 }
 0x111   :  { %1480 = vmatmul.bf16.gmra.mxu2 %v3115_v30  ;;  %v2735_v30 = vor.u32 %v3450_v19, %v2732_v20 }
 0x112   :  { %1569 = vmatmul.bf16.gmra.mxu3 %v3119_v31 }
 0x114   :  { %v1441_v34 = vpop.f32.mrf.mxu2  ;;  %v1265_v37 = vpop.f32.mrf.mxu0 }
 0x115   :  { %v1530_v35 = vpop.f32.mrf.mxu3  ;;  %v1442_v36 = vadd.f32 %v1441_v34, %v1353_v33  ;;  %v1354_v38 = vpop.f32.mrf.mxu1  ;;  %v1266_v40 = vadd.f32 %v3919_v16, %v1265_v37  ;;  %v2739_v34 = vor.u32 %v3454_v23, %v2738_v21  ;;  %v2786_v21 = vld [vmem:[#allocation2 + $0x80] sm:$0xf]  ;;  %v3467_v23 = vld [vmem:[#allocation2 + $0x98] sm:$0xf0] }
 0x117   :  { %v3963_v43 = vadd.f32 %v1530_v35, %v1442_v36  ;;  %v1355_v44 = vadd.f32 %v1354_v38, %v1266_v40 }
 0x11c   :  { %v1443_v54 = vpop.f32.mrf.mxu2  ;;  %v1268_v61 = vpop.f32.mrf.mxu0 }
 0x11d   :  { %v3965_v55 = vpop.f32.mrf.mxu3  ;;  %v3967_v59 = vadd.f32 %v1443_v54, %v1355_v44  ;;  %v1357_v63 = vpop.f32.mrf.mxu1  ;;  %v1269_v2 = vadd.f32 %v3919_v16, %v1268_v61  ;;  %v2766_v54 = vld [vmem:[#allocation2 + $0x50] sm:$0xf] }
 0x11f   :  { %v1358_v3 = vadd.f32 %v1357_v63, %v1269_v2  ;;  %1307 = vmatmul.bf16.gmra.mxu0 %v3135_v57  ;;  %v3461_v57 = vld [vmem:[#allocation2 + $0x68] sm:$0xf0]  ;;  %v2759_v63 = vor.u32 %v3460_v50, %v2758_v49 }
 0x120   :  { %1396 = vmatmul.bf16.gmra.mxu1 %v3139_v58  ;;  %v2767_v4 = vor.u32 %v3461_v57, %v2766_v54 }
 0x121   :  { %1485 = vmatmul.bf16.gmra.mxu2 %v3143_v0  ;;  %v2763_v0 = vor.u32 %v3457_v51, %v2760_v52 }
 0x122   :  { %1574 = vmatmul.bf16.gmra.mxu3 %v3147_v1 }
 0x124   :  { %v1446_v5 = vpop.f32.mrf.mxu2  ;;  %v1270_v11 = vpop.f32.mrf.mxu0 }
 0x125   :  { %v1535_v8 = vpop.f32.mrf.mxu3  ;;  %v1447_v9 = vadd.f32 %v1446_v5, %v1358_v3  ;;  %v1359_v12 = vpop.f32.mrf.mxu1  ;;  %v1271_v13 = vadd.f32 %v3919_v16, %v1270_v11 }
 0x127   :  { %v3971_v14 = vadd.f32 %v1535_v8, %v1447_v9  ;;  %v1360_v15 = vadd.f32 %v1359_v12, %v1271_v13  ;;  %v3618_v9 = vld [vmem:[#allocation7 + $0x10] sm:$0xff] }
 0x128   :  { %1968 = vmatpush.bf16.msrb.mxu3 %v3618_v9 }
 0x12c   :  { %v1448_v24 = vpop.f32.mrf.mxu2  ;;  %v1273_v32 = vpop.f32.mrf.mxu0 }
 0x12d   :  { %v3973_v26 = vpop.f32.mrf.mxu3  ;;  %v3975_v31 = vadd.f32 %v1448_v24, %v1360_v15  ;;  %v1362_v33 = vpop.f32.mrf.mxu1  ;;  %v1274_v35 = vadd.f32 %v3919_v16, %v1273_v32  ;;  %v3464_v24 = vld [vmem:[#allocation2 + $0x84] sm:$0xf] }
 0x12e   :  { %v3468_v32 = vld [vmem:[#allocation2 + $0xa0] sm:$0xf0] }
 0x12f   :  { %v1363_v36 = vadd.f32 %v1362_v33, %v1274_v35  ;;  %1588 = vmatmul.bf16.vlgmr.msrb.gmra.mxu0 %v2731_v27  ;;  %v2788_v27 = vld [vmem:[#allocation2 + $0x9c] sm:$0xf0]  ;;  %v2787_v35 = vor.u32 %v3467_v23, %v2786_v21  ;;  %v3617_v23 = vld [vmem:[#allocation7 + $0x8] sm:$0xff] }
 0x130   :  { %1677 = vmatmul.bf16.vlgmr.msrb.gmra.mxu1 %v2735_v30  ;;  %v2794_v30 = vld [vmem:[#allocation2 + $0x88] sm:$0xf]  ;;  %1969 = vmatpush.bf16.msrb.mxu3 %v3617_v23  ;;  %v3488_v23 = vld [vmem:[#allocation2 + $0x140] sm:$0xf0] }
 0x131   :  { %1766 = vmatmul.bf16.vlgmr.msrb.gmra.mxu2 %v2739_v34 }
 0x134   :  { %v1451_v37 = vpop.f32.mrf.mxu2  ;;  %v1275_v44 = vpop.f32.mrf.mxu0 }
 0x135   :  { %v1540_v38 = vpop.f32.mrf.mxu3  ;;  %v1452_v40 = vadd.f32 %v1451_v37, %v1363_v36  ;;  %v1364_v45 = vpop.f32.mrf.mxu1  ;;  %v1276_v46 = vadd.f32 %v3919_v16, %v1275_v44  ;;  %v2791_v36 = vor.u32 %v3464_v24, %v2788_v27  ;;  %v2795_v44 = vor.u32 %v3468_v32, %v2794_v30 }
 0x137   :  { %v3979_v47 = vadd.f32 %v1540_v38, %v1452_v40  ;;  %v1365_v48 = vadd.f32 %v1364_v45, %v1276_v46 }
 0x13c   :  { %v1453_v58 = vpop.f32.mrf.mxu2  ;;  %v1278_v2 = vpop.f32.mrf.mxu0 }
 0x13d   :  { %v3981_v61 = vpop.f32.mrf.mxu3  ;;  %v3983_v1 = vadd.f32 %v1453_v58, %v1365_v48  ;;  %v1367_v3 = vpop.f32.mrf.mxu1  ;;  %v1279_v5 = vadd.f32 %v3919_v16, %v1278_v2  ;;  %v3471_v2 = vld [vmem:[#allocation2 + $0xbc] sm:$0xf] }
 0x13f   :  { %v1368_v8 = vadd.f32 %v1367_v3, %v1279_v5  ;;  %1593 = vmatmul.bf16.gmra.mxu0 %v2759_v63  ;;  %v2814_v63 = vld [vmem:[#allocation2 + $0xb8] sm:$0xf]  ;;  %v3475_v5 = vld [vmem:[#allocation2 + $0xd8] sm:$0xf0] }
 0x140   :  { %1682 = vmatmul.bf16.gmra.mxu1 %v2763_v0  ;;  %v3474_v0 = vld [vmem:[#allocation2 + $0xd0] sm:$0xf0]  ;;  %v2816_v3 = vld [vmem:[#allocation2 + $0xd4] sm:$0xf0] }
 0x141   :  { %1771 = vmatmul.bf16.gmra.mxu2 %v2767_v4  ;;  %v2822_v4 = vld [vmem:[#allocation2 + $0xc0] sm:$0xf] }
 0x144   :  { %v1456_v11 = vpop.f32.mrf.mxu2  ;;  %v1280_v15 = vpop.f32.mrf.mxu0 }
 0x145   :  { %v1545_v12 = vpop.f32.mrf.mxu3  ;;  %v1457_v13 = vadd.f32 %v1456_v11, %v1368_v8  ;;  %v1369_v17 = vpop.f32.mrf.mxu1  ;;  %v1281_v18 = vadd.f32 %v3919_v16, %v1280_v15  ;;  %v2815_v11 = vor.u32 %v3474_v0, %v2814_v63 }
 0x147   :  { %v3987_v19 = vadd.f32 %v1545_v12, %v1457_v13  ;;  %v1370_v20 = vadd.f32 %v1369_v17, %v1281_v18  ;;  %v2819_v12 = vor.u32 %v3471_v2, %v2816_v3  ;;  %v2823_v18 = vor.u32 %v3475_v5, %v2822_v4 }
 0x14c   :  { %v1458_v33 = vpop.f32.mrf.mxu2  ;;  %v1283_v38 = vpop.f32.mrf.mxu0 }
 0x14d   :  { %v3989_v34 = vpop.f32.mrf.mxu3  ;;  %v3991_v37 = vadd.f32 %v1458_v33, %v1370_v20  ;;  %v1372_v40 = vpop.f32.mrf.mxu1  ;;  %v1284_v45 = vadd.f32 %v3919_v16, %v1283_v38 }
 0x14f   :  { %v1373_v46 = vadd.f32 %v1372_v40, %v1284_v45  ;;  %1598 = vmatmul.bf16.gmra.mxu0 %v2787_v35  ;;  %v2842_v40 = vld [vmem:[#allocation2 + $0xf0] sm:$0xf]  ;;  %v3478_v45 = vld [vmem:[#allocation2 + $0xf4] sm:$0xf] }
 0x150   :  { %1687 = vmatmul.bf16.gmra.mxu1 %v2791_v36 }
 0x151   :  { %1776 = vmatmul.bf16.gmra.mxu2 %v2795_v44  ;;  %v3481_v44 = vld [vmem:[#allocation2 + $0x108] sm:$0xf0] }
 0x154   :  { %v1461_v48 = vpop.f32.mrf.mxu2  ;;  %v1285_v51 = vpop.f32.mrf.mxu0 }
 0x155   :  { %v1550_v49 = vpop.f32.mrf.mxu3  ;;  %v1462_v50 = vadd.f32 %v1461_v48, %v1373_v46  ;;  %v1374_v52 = vpop.f32.mrf.mxu1  ;;  %v1286_v54 = vadd.f32 %v3919_v16, %v1285_v51  ;;  %v2844_v46 = vld [vmem:[#allocation2 + $0x10c] sm:$0xf0]  ;;  %v2850_v48 = vld [vmem:[#allocation2 + $0xf8] sm:$0xf] }
 0x157   :  { %v3995_v57 = vadd.f32 %v1550_v49, %v1462_v50  ;;  %v1375_v58 = vadd.f32 %v1374_v52, %v1286_v54  ;;  %v3482_v49 = vld [vmem:[#allocation2 + $0x110] sm:$0xf0]  ;;  %v2843_v52 = vor.u32 %v3481_v44, %v2842_v40  ;;  %v2847_v54 = vor.u32 %v3478_v45, %v2844_v46 }
 0x158   :  { %v2851_v2 = vor.u32 %v3482_v49, %v2850_v48 }
 0x15c   :  { %v1463_v8 = vpop.f32.mrf.mxu2  ;;  %v1288_v15 = vpop.f32.mrf.mxu0 }
 0x15d   :  { %v3997_v9 = vpop.f32.mrf.mxu3  ;;  %v3999_v13 = vadd.f32 %v1463_v8, %v1375_v58  ;;  %v1377_v17 = vpop.f32.mrf.mxu1  ;;  %v1289_v20 = vadd.f32 %v3919_v16, %v1288_v15 }
 0x15f   :  { %v1378_v21 = vadd.f32 %v1377_v17, %v1289_v20  ;;  %1603 = vmatmul.bf16.gmra.mxu0 %v2815_v11 }
 0x160   :  { %1692 = vmatmul.bf16.gmra.mxu1 %v2819_v12 }
 0x161   :  { %1781 = vmatmul.bf16.gmra.mxu2 %v2823_v18 }
 0x164   :  { %v1466_v24 = vpop.f32.mrf.mxu2  ;;  %v1290_v32 = vpop.f32.mrf.mxu0 }
 0x165   :  { %v1555_v27 = vpop.f32.mrf.mxu3  ;;  %v1467_v30 = vadd.f32 %v1466_v24, %v1378_v21  ;;  %v1379_v33 = vpop.f32.mrf.mxu1  ;;  %v1291_v35 = vadd.f32 %v3919_v16, %v1290_v32  ;;  %v2870_v21 = vld [vmem:[#allocation2 + $0x128] sm:$0xf]  ;;  %v3485_v24 = vld [vmem:[#allocation2 + $0x12c] sm:$0xf] }
 0x166   :  { %v3489_v32 = vld [vmem:[#allocation2 + $0x148] sm:$0xf0] }
 0x167   :  { %v4003_v36 = vadd.f32 %v1555_v27, %v1467_v30  ;;  %v1380_v38 = vadd.f32 %v1379_v33, %v1291_v35  ;;  %v2872_v27 = vld [vmem:[#allocation2 + $0x144] sm:$0xf0]  ;;  %v2878_v30 = vld [vmem:[#allocation2 + $0x130] sm:$0xf] }
 0x168   :  { %v2875_v40 = vor.u32 %v3485_v24, %v2872_v27  ;;  %v2879_v48 = vor.u32 %v3489_v32, %v2878_v30 }
 0x16c   :  { %v1468_v50 = vpop.f32.mrf.mxu2  ;;  %v1293_v63 = vpop.f32.mrf.mxu0 }
 0x16d   :  { %v4005_v51 = vpop.f32.mrf.mxu3  ;;  %v4007_v58 = vadd.f32 %v1468_v50, %v1380_v38  ;;  %v1382_v0 = vpop.f32.mrf.mxu1  ;;  %v1294_v3 = vadd.f32 %v3919_v16, %v1293_v63  ;;  %v2871_v38 = vor.u32 %v3488_v23, %v2870_v21  ;;  %v3496_v21 = vld [vmem:[#allocation2 + $0x180] sm:$0xf0] }
 0x16f   :  { %v1383_v4 = vadd.f32 %v1382_v0, %v1294_v3  ;;  %1608 = vmatmul.bf16.gmra.mxu0 %v2843_v52  ;;  %v3616_v52 = vld [vmem:[#allocation7] sm:$0xff] }
 0x170   :  { %1697 = vmatmul.bf16.gmra.mxu1 %v2847_v54  ;;  %1970 = vmatpush.bf16.msrb.mxu3 %v3616_v52 }
 0x171   :  { %1786 = vmatmul.bf16.gmra.mxu2 %v2851_v2 }
 0x174   :  { %v1471_v5 = vpop.f32.mrf.mxu2  ;;  %v1295_v12 = vpop.f32.mrf.mxu0 }
 0x175   :  { %v1560_v8 = vpop.f32.mrf.mxu3  ;;  %v1472_v11 = vadd.f32 %v1471_v5, %v1383_v4  ;;  %v1384_v15 = vpop.f32.mrf.mxu1  ;;  %v1296_v17 = vadd.f32 %v3919_v16, %v1295_v12  ;;  %v3495_v12 = vld [vmem:[#allocation2 + $0x178] sm:$0xf0] }
 0x177   :  { %v4011_v18 = vadd.f32 %v1560_v8, %v1472_v11  ;;  %v1385_v20 = vadd.f32 %v1384_v15, %v1296_v17  ;;  %v2898_v11 = vld [vmem:[#allocation2 + $0x160] sm:$0xf]  ;;  %v3492_v15 = vld [vmem:[#allocation2 + $0x164] sm:$0xf] }
 0x178   :  { %v2900_v17 = vld [vmem:[#allocation2 + $0x17c] sm:$0xf0]  ;;  %v2899_v27 = vor.u32 %v3495_v12, %v2898_v11  ;;  %v2928_v11 = vld [vmem:[#allocation2 + $0x1b4] sm:$0xf0] }
 0x179   :  { %v2903_v30 = vor.u32 %v3492_v15, %v2900_v17  ;;  %v2934_v12 = vld [vmem:[#allocation2 + $0x1a0] sm:$0xf]  ;;  %v3503_v15 = vld [vmem:[#allocation2 + $0x1b8] sm:$0xf0] }
 0x17c   :  { %v1473_v33 = vpop.f32.mrf.mxu2  ;;  %v1298_v45 = vpop.f32.mrf.mxu0 }
 0x17d   :  { %v4013_v35 = vpop.f32.mrf.mxu3  ;;  %v4015_v44 = vadd.f32 %v1473_v33, %v1385_v20  ;;  %v1387_v46 = vpop.f32.mrf.mxu1  ;;  %v1299_v49 = vadd.f32 %v3919_v16, %v1298_v45  ;;  %v2906_v20 = vld [vmem:[#allocation2 + $0x168] sm:$0xf] }
 0x17f   :  { %v1388_v50 = vadd.f32 %v1387_v46, %v1299_v49  ;;  %1613 = vmatmul.bf16.gmra.mxu0 %v2871_v38 }
 0x180   :  { %1702 = vmatmul.bf16.gmra.mxu1 %v2875_v40  ;;  %v2907_v40 = vor.u32 %v3496_v21, %v2906_v20 }
 0x181   :  { %1791 = vmatmul.bf16.gmra.mxu2 %v2879_v48 }
 0x184   :  { %v1476_v54 = vpop.f32.mrf.mxu2  ;;  %v1300_v2 = vpop.f32.mrf.mxu0 }
 0x185   :  { %v1565_v63 = vpop.f32.mrf.mxu3  ;;  %v1477_v0 = vadd.f32 %v1476_v54, %v1388_v50  ;;  %v1389_v3 = vpop.f32.mrf.mxu1  ;;  %v1301_v4 = vadd.f32 %v3919_v16, %v1300_v2 }
 0x187   :  { %v4019_v5 = vadd.f32 %v1565_v63, %v1477_v0  ;;  %v1390_v8 = vadd.f32 %v1389_v3, %v1301_v4  ;;  %v2926_v3 = vld [vmem:[#allocation2 + $0x198] sm:$0xf]  ;;  %v3502_v4 = vld [vmem:[#allocation2 + $0x1b0] sm:$0xf0] }
 0x188   :  { %v2927_v21 = vor.u32 %v3502_v4, %v2926_v3  ;;  %v2954_v3 = vld [vmem:[#allocation2 + $0x1d0] sm:$0xf]  ;;  %v3509_v4 = vld [vmem:[#allocation2 + $0x1e8] sm:$0xf0] }
 0x18c   :  { %v1478_v23 = vpop.f32.mrf.mxu2  ;;  %v1303_v33 = vpop.f32.mrf.mxu0 }
 0x18d   :  { %v4021_v24 = vpop.f32.mrf.mxu3  ;;  %v4023_v32 = vadd.f32 %v1478_v23, %v1390_v8  ;;  %v1392_v38 = vpop.f32.mrf.mxu1  ;;  %v1304_v45 = vadd.f32 %v3919_v16, %v1303_v33  ;;  %v3499_v8 = vld [vmem:[#allocation2 + $0x19c] sm:$0xf] }
 0x18e   :  { %v2931_v23 = vor.u32 %v3499_v8, %v2928_v11  ;;  %v3506_v8 = vld [vmem:[#allocation2 + $0x1d4] sm:$0xf]  ;;  %v2956_v11 = vld [vmem:[#allocation2 + $0x1ec] sm:$0xf0] }
 0x18f   :  { %v1393_v46 = vadd.f32 %v1392_v38, %v1304_v45  ;;  %1618 = vmatmul.bf16.gmra.mxu0 %v2899_v27  ;;  %v2935_v38 = vor.u32 %v3503_v15, %v2934_v12  ;;  %v2962_v12 = vld [vmem:[#allocation2 + $0x1d8] sm:$0xf]  ;;  %v3510_v15 = vld [vmem:[#allocation2 + $0x1f0] sm:$0xf0] }
 0x190   :  { %1707 = vmatmul.bf16.gmra.mxu1 %v2903_v30 }
 0x191   :  { %1796 = vmatmul.bf16.gmra.mxu2 %v2907_v40 }
 0x194   :  { %v1481_v48 = vpop.f32.mrf.mxu2  ;;  %v1305_v52 = vpop.f32.mrf.mxu0 }
 0x195   :  { %v1570_v49 = vpop.f32.mrf.mxu3  ;;  %v1482_v50 = vadd.f32 %v1481_v48, %v1393_v46  ;;  %v1394_v54 = vpop.f32.mrf.mxu1  ;;  %v1306_v63 = vadd.f32 %v3919_v16, %v1305_v52 }
 0x197   :  { %v4027_v0 = vadd.f32 %v1570_v49, %v1482_v50  ;;  %v1395_v2 = vadd.f32 %v1394_v54, %v1306_v63 }
 0x19c   :  { %v1483_v17 = vpop.f32.mrf.mxu2  ;;  %v1308_v30 = vpop.f32.mrf.mxu0 }
 0x19d   :  { %v4029_v20 = vpop.f32.mrf.mxu3  ;;  %v4031_v27 = vadd.f32 %v1483_v17, %v1395_v2  ;;  %v1397_v33 = vpop.f32.mrf.mxu1  ;;  %v1309_v40 = vadd.f32 %v3919_v16, %v1308_v30 }
 0x19f   :  { %v1398_v45 = vadd.f32 %v1397_v33, %v1309_v40  ;;  %1623 = vmatmul.bf16.gmra.mxu0 %v2927_v21  ;;  %v2955_v21 = vor.u32 %v3509_v4, %v2954_v3  ;;  %v2963_v40 = vor.u32 %v3510_v15, %v2962_v12  ;;  %v3513_v3 = vld [vmem:[#allocation2 + $0x20c] sm:$0xf]  ;;  %v2984_v4 = vld [vmem:[#allocation2 + $0x224] sm:$0xf0] }
 0x1a0   :  { %1712 = vmatmul.bf16.gmra.mxu1 %v2931_v23  ;;  %v2959_v23 = vor.u32 %v3506_v8, %v2956_v11  ;;  %v3517_v8 = vld [vmem:[#allocation2 + $0x228] sm:$0xf0] }
 0x1a1   :  { %1801 = vmatmul.bf16.gmra.mxu2 %v2935_v38 }
 0x1a4   :  { %v1486_v46 = vpop.f32.mrf.mxu2  ;;  %v1310_v50 = vpop.f32.mrf.mxu0 }
 0x1a5   :  { %v1575_v48 = vpop.f32.mrf.mxu3  ;;  %v1487_v49 = vadd.f32 %v1486_v46, %v1398_v45  ;;  %v1399_v52 = vpop.f32.mrf.mxu1  ;;  %v1311_v54 = vadd.f32 %v3919_v16, %v1310_v50  ;;  %v2982_v50 = vld [vmem:[#allocation2 + $0x208] sm:$0xf] }
 0x1a7   :  { %v4035_v63 = vadd.f32 %v1575_v48, %v1487_v49  ;;  %v1400_v2 = vadd.f32 %v1399_v52, %v1311_v54  ;;  %v3516_v54 = vld [vmem:[#allocation2 + $0x220] sm:$0xf0] }
 0x1a8   :  { %v2983_v15 = vor.u32 %v3516_v54, %v2982_v50  ;;  %v3520_v54 = vld [vmem:[#allocation2 + $0x244] sm:$0xf] }
 0x1a9   :  { %4164 = vst [vmem:[#allocation12_spill] sm:$0xff] %v4035_v63 }
 0x1ac   :  { %v1488_v17 = vpop.f32.mrf.mxu2  ;;  %v1589_v33 = vpop.f32.mrf.mxu0 }
 0x1ad   :  { %v4037_v30 = vadd.f32 %v1488_v17, %v1400_v2  ;;  %v1678_v38 = vpop.f32.mrf.mxu1  ;;  %v1590_v45 = vadd.f32 %v1589_v33, %v3923_v42  ;;  %v2990_v2 = vld [vmem:[#allocation2 + $0x210] sm:$0xf] }
 0x1ae   :  { %v2991_v42 = vor.u32 %v3517_v8, %v2990_v2  ;;  %v3524_v2 = vld [vmem:[#allocation2 + $0x260] sm:$0xf0] }
 0x1af   :  { %4165 = vst [vmem:[#allocation13_spill] sm:$0xff] %v4037_v30  ;;  %1628 = vmatmul.bf16.gmra.mxu0 %v2955_v21  ;;  %v1679_v52 = vadd.f32 %v1678_v38, %v1590_v45  ;;  %v2987_v21 = vor.u32 %v3513_v3, %v2984_v4  ;;  %v3012_v3 = vld [vmem:[#allocation2 + $0x25c] sm:$0xf0]  ;;  %v3018_v4 = vld [vmem:[#allocation2 + $0x248] sm:$0xf] }
 0x1b0   :  { %1717 = vmatmul.bf16.gmra.mxu1 %v2959_v23 }
 0x1b1   :  { %1806 = vmatmul.bf16.gmra.mxu2 %v2963_v40 }
 0x1b4   :  { %v1767_v16 = vpop.f32.mrf.mxu2  ;;  %v1591_v46 = vpop.f32.mrf.mxu0 }
 0x1b5   :  { %v1680_v48 = vpop.f32.mrf.mxu1  ;;  %v1592_v49 = vadd.f32 %v1591_v46, %v3926_v62  ;;  %v1768_v11 = vadd.f32 %v1767_v16, %v1679_v52  ;;  %v3523_v52 = vld [vmem:[#allocation2 + $0x258] sm:$0xf0] }
 0x1b7   :  { %v1681_v17 = vadd.f32 %v1680_v48, %v1592_v49  ;;  %v1847_v33 = vmax.f32 %v1768_v11, 0.0  ;;  %v3010_v49 = vld [vmem:[#allocation2 + $0x240] sm:$0xf] }
 0x1bc   :  { %v1769_v12 = vpop.f32.mrf.mxu2  ;;  %v1594_v40 = vpop.f32.mrf.mxu0 }
 0x1bd   :  { %v1770_v23 = vadd.f32 %v1769_v12, %v1681_v17  ;;  %v1683_v30 = vpop.f32.mrf.mxu1  ;;  %v1595_v45 = vadd.f32 %v1594_v40, %v3929_v7  ;;  %v3015_v12 = vor.u32 %v3520_v54, %v3012_v3  ;;  %v3019_v7 = vor.u32 %v3524_v2, %v3018_v4  ;;  %v3531_v54 = vld [vmem:[#allocation2 + $0x298] sm:$0xf0] }
 0x1bf   :  { %v1848_v63 = vmax.f32 %v1770_v23, 0.0  ;;  %1633 = vmatmul.bf16.gmra.mxu0 %v2983_v15  ;;  %v1684_v50 = vadd.f32 %v1683_v30, %v1595_v45 }
 0x1c0   :  { %1722 = vmatmul.bf16.gmra.mxu1 %v2987_v21 }
 0x1c1   :  { %v1879_v62 = vpack.c.bf16 %v1848_v63, %v1847_v33  ;;  %1811 = vmatmul.bf16.gmra.mxu2 %v2991_v42  ;;  %v3011_v63 = vor.u32 %v3523_v52, %v3010_v49  ;;  %v3527_v49 = vld [vmem:[#allocation2 + $0x27c] sm:$0xf]  ;;  %v3046_v52 = vld [vmem:[#allocation2 + $0x280] sm:$0xf] }
 0x1c3   :  { %1971 = vmatmul.bf16.vlgmr.msrb.gmra.mxu3 %v1879_v62 }
 0x1c4   :  { %v1772_v38 = vpop.f32.mrf.mxu2  ;;  %v1596_v46 = vpop.f32.mrf.mxu0 }
 0x1c5   :  { %v1685_v16 = vpop.f32.mrf.mxu1  ;;  %v1597_v48 = vadd.f32 %v1596_v46, %v3932_v28  ;;  %v1773_v8 = vadd.f32 %v1772_v38, %v1684_v50  ;;  %v3038_v46 = vld [vmem:[#allocation2 + $0x278] sm:$0xf] }
 0x1c6   :  { %v3040_v50 = vld [vmem:[#allocation2 + $0x294] sm:$0xf0] }
 0x1c7   :  { %v1686_v11 = vadd.f32 %v1685_v16, %v1597_v48  ;;  %v1849_v40 = vmax.f32 %v1773_v8, 0.0  ;;  %v3530_v48 = vld [vmem:[#allocation2 + $0x290] sm:$0xf0] }
 0x1c8   :  { %v3039_v8 = vor.u32 %v3530_v48, %v3038_v46  ;;  %v3074_v46 = vld [vmem:[#allocation2 + $0x2b8] sm:$0xf] }
 0x1cc   :  { %v1774_v17 = vpop.f32.mrf.mxu2  ;;  %v1599_v21 = vpop.f32.mrf.mxu0 }
 0x1cd   :  { %v1775_v15 = vadd.f32 %v1774_v17, %v1686_v11  ;;  %v1688_v23 = vpop.f32.mrf.mxu1  ;;  %v1600_v33 = vadd.f32 %v1599_v21, %v3935_v39  ;;  %v3043_v11 = vor.u32 %v3527_v49, %v3040_v50  ;;  %v3047_v39 = vor.u32 %v3531_v54, %v3046_v52 }
 0x1cf   :  { %v1850_v42 = vmax.f32 %v1775_v15, 0.0  ;;  %1638 = vmatmul.bf16.gmra.mxu0 %v3011_v63  ;;  %v1689_v16 = vadd.f32 %v1688_v23, %v1600_v33 }
 0x1d0   :  { %1727 = vmatmul.bf16.gmra.mxu1 %v3015_v12 }
 0x1d1   :  { %1816 = vmatmul.bf16.gmra.mxu2 %v3019_v7  ;;  %v1880_v28 = vpack.c.bf16 %v1850_v42, %v1849_v40 }
 0x1d3   :  { %1976 = vmatmul.bf16.gmra.mxu3 %v1880_v28 }
 0x1d4   :  { %v1777_v30 = vpop.f32.mrf.mxu2  ;;  %v1601_v62 = vpop.f32.mrf.mxu0 }
 0x1d5   :  { %v1690_v38 = vpop.f32.mrf.mxu1  ;;  %v1602_v45 = vadd.f32 %v1601_v62, %v3938_v60  ;;  %v1778_v3 = vadd.f32 %v1777_v30, %v1689_v16  ;;  %v3066_v30 = vld [vmem:[#allocation2 + $0x2b0] sm:$0xf]  ;;  %v3537_v62 = vld [vmem:[#allocation2 + $0x2c8] sm:$0xf0]  ;;  %v3538_v16 = vld [vmem:[#allocation2 + $0x2d0] sm:$0xf0] }
 0x1d6   :  { %v3067_v52 = vor.u32 %v3537_v62, %v3066_v30  ;;  %v3545_v30 = vld [vmem:[#allocation2 + $0x308] sm:$0xf0] }
 0x1d7   :  { %v1691_v4 = vadd.f32 %v1690_v38, %v1602_v45  ;;  %v1851_v15 = vmax.f32 %v1778_v3, 0.0  ;;  %v3534_v38 = vld [vmem:[#allocation2 + $0x2b4] sm:$0xf]  ;;  %v3068_v45 = vld [vmem:[#allocation2 + $0x2cc] sm:$0xf0] }
 0x1d8   :  { %v3071_v54 = vor.u32 %v3534_v38, %v3068_v45 }
 0x1dc   :  { %v1779_v2 = vpop.f32.mrf.mxu2  ;;  %v1604_v63 = vpop.f32.mrf.mxu0 }
 0x1dd   :  { %v1780_v17 = vadd.f32 %v1779_v2, %v1691_v4  ;;  %v1693_v12 = vpop.f32.mrf.mxu1  ;;  %v1605_v7 = vadd.f32 %v1604_v63, %v3941_v6  ;;  %v3075_v6 = vor.u32 %v3538_v16, %v3074_v46  ;;  %v1523_v63 = vadd.f32 %v3949_v53, %v3951_v56 }
 0x1df   :  { %v1852_v21 = vmax.f32 %v1780_v17, 0.0  ;;  %1643 = vmatmul.bf16.gmra.mxu0 %v3039_v8  ;;  %v1694_v33 = vadd.f32 %v1693_v12, %v1605_v7  ;;  %v3544_v7 = vld [vmem:[#allocation2 + $0x300] sm:$0xf0] }
 0x1e0   :  { %1732 = vmatmul.bf16.gmra.mxu1 %v3043_v11 }
 0x1e1   :  { %1821 = vmatmul.bf16.gmra.mxu2 %v3047_v39  ;;  %v1881_v60 = vpack.c.bf16 %v1852_v21, %v1851_v15 }
 0x1e3   :  { %1981 = vmatmul.bf16.gmra.mxu3 %v1881_v60  ;;  %v3094_v60 = vld [vmem:[#allocation2 + $0x2e8] sm:$0xf] }
 0x1e4   :  { %v1782_v23 = vpop.f32.mrf.mxu2  ;;  %v1606_v40 = vpop.f32.mrf.mxu0  ;;  %v3095_v45 = vor.u32 %v3544_v7, %v3094_v60 }
 0x1e5   :  { %v1695_v42 = vpop.f32.mrf.mxu1  ;;  %v1607_v28 = vadd.f32 %v1606_v40, %v3944_v29  ;;  %v1783_v48 = vadd.f32 %v1782_v23, %v1694_v33  ;;  %v3541_v40 = vld [vmem:[#allocation2 + $0x2ec] sm:$0xf] }
 0x1e7   :  { %v1696_v49 = vadd.f32 %v1695_v42, %v1607_v28  ;;  %v1853_v8 = vmax.f32 %v1783_v48, 0.0  ;;  %v3096_v42 = vld [vmem:[#allocation2 + $0x304] sm:$0xf0]  ;;  %v3102_v28 = vld [vmem:[#allocation2 + $0x2f0] sm:$0xf] }
 0x1e8   :  { %v3099_v46 = vor.u32 %v3541_v40, %v3096_v42  ;;  %v3103_v56 = vor.u32 %v3545_v30, %v3102_v28 }
 0x1ec   :  { %v1784_v50 = vpop.f32.mrf.mxu2  ;;  %v1609_v4 = vpop.f32.mrf.mxu0 }
 0x1ed   :  { %v1785_v3 = vadd.f32 %v1784_v50, %v1696_v49  ;;  %v1698_v2 = vpop.f32.mrf.mxu1  ;;  %v1610_v12 = vadd.f32 %v1609_v4, %v3947_v41 }
 0x1ef   :  { %v1854_v11 = vmax.f32 %v1785_v3, 0.0  ;;  %1648 = vmatmul.bf16.gmra.mxu0 %v3067_v52  ;;  %v1699_v23 = vadd.f32 %v1698_v2, %v1610_v12  ;;  %v3130_v12 = vld [vmem:[#allocation2 + $0x328] sm:$0xf] }
 0x1f0   :  { %1737 = vmatmul.bf16.gmra.mxu1 %v3071_v54  ;;  %v1528_v54 = vadd.f32 %v3957_v22, %v3959_v25 }
 0x1f1   :  { %1826 = vmatmul.bf16.gmra.mxu2 %v3075_v6  ;;  %v1882_v29 = vpack.c.bf16 %v1854_v11, %v1853_v8  ;;  %v3122_v8 = vld [vmem:[#allocation2 + $0x320] sm:$0xf] }
 0x1f3   :  { %1986 = vmatmul.bf16.gmra.mxu3 %v1882_v29  ;;  %v3551_v29 = vld [vmem:[#allocation2 + $0x338] sm:$0xf0] }
 0x1f4   :  { %v1787_v17 = vpop.f32.mrf.mxu2  ;;  %v1611_v39 = vpop.f32.mrf.mxu0 }
 0x1f5   :  { %v1700_v15 = vpop.f32.mrf.mxu1  ;;  %v1612_v21 = vadd.f32 %v1611_v39, %v1523_v63  ;;  %v1788_v33 = vadd.f32 %v1787_v17, %v1699_v23  ;;  %v3548_v17 = vld [vmem:[#allocation2 + $0x324] sm:$0xf]  ;;  %v3124_v63 = vld [vmem:[#allocation2 + $0x33c] sm:$0xf0]  ;;  %v3123_v23 = vor.u32 %v3551_v29, %v3122_v8 }
 0x1f6   :  { %v3552_v39 = vld [vmem:[#allocation2 + $0x340] sm:$0xf0]  ;;  %v3127_v7 = vor.u32 %v3548_v17, %v3124_v63 }
 0x1f7   :  { %v1701_v62 = vadd.f32 %v1700_v15, %v1612_v21  ;;  %v1855_v41 = vmax.f32 %v1788_v33, 0.0  ;;  %v3131_v25 = vor.u32 %v3552_v39, %v3130_v12  ;;  %v1538_v12 = vadd.f32 %v3973_v26, %v3975_v31 }
 0x1f8   :  { %v1543_v26 = vadd.f32 %v3981_v61, %v3983_v1  ;;  %v1548_v1 = vadd.f32 %v3989_v34, %v3991_v37 }
 0x1fc   :  { %v1789_v38 = vpop.f32.mrf.mxu2  ;;  %v1614_v48 = vpop.f32.mrf.mxu0 }
 0x1fd   :  { %v1790_v16 = vadd.f32 %v1789_v38, %v1701_v62  ;;  %v1703_v53 = vpop.f32.mrf.mxu1  ;;  %v1615_v3 = vadd.f32 %v1614_v48, %v3955_v10  ;;  %v1533_v62 = vadd.f32 %v3965_v55, %v3967_v59  ;;  %v3150_v48 = vld [vmem:[#allocation2 + $0x358] sm:$0xf] }
 0x1ff   :  { %v1856_v49 = vmax.f32 %v1790_v16, 0.0  ;;  %1653 = vmatmul.bf16.gmra.mxu0 %v3095_v45  ;;  %v1704_v11 = vadd.f32 %v1703_v53, %v1615_v3 }
 0x200   :  { %1742 = vmatmul.bf16.gmra.mxu1 %v3099_v46 }
 0x201   :  { %v1883_v50 = vpack.c.bf16 %v1856_v49, %v1855_v41  ;;  %1831 = vmatmul.bf16.gmra.mxu2 %v3103_v56  ;;  %v3558_v56 = vld [vmem:[#allocation2 + $0x370] sm:$0xf0]  ;;  %v3555_v41 = vld [vmem:[#allocation2 + $0x35c] sm:$0xf]  ;;  %v3152_v49 = vld [vmem:[#allocation2 + $0x374] sm:$0xf0] }
 0x203   :  { %1991 = vmatmul.bf16.gmra.mxu3 %v1883_v50  ;;  %v3158_v50 = vld [vmem:[#allocation2 + $0x360] sm:$0xf] }
 0x204   :  { %v1792_v52 = vpop.f32.mrf.mxu2  ;;  %v1616_v4 = vpop.f32.mrf.mxu0 }
 0x205   :  { %v1705_v2 = vpop.f32.mrf.mxu1  ;;  %v1617_v6 = vadd.f32 %v1616_v4, %v1528_v54  ;;  %v1793_v15 = vadd.f32 %v1792_v52, %v1704_v11  ;;  %v3559_v52 = vld [vmem:[#allocation2 + $0x378] sm:$0xf0] }
 0x206   :  { %v3159_v59 = vor.u32 %v3559_v52, %v3158_v50  ;;  %v4062_v50 = vpop.f32.mrf.mxu3 }
 0x207   :  { %v1706_v21 = vadd.f32 %v1705_v2, %v1617_v6  ;;  %v1857_v10 = vmax.f32 %v1793_v15, 0.0  ;;  %v3151_v2 = vor.u32 %v3558_v56, %v3150_v48  ;;  %v3155_v6 = vor.u32 %v3555_v41, %v3152_v49 }
 0x20c   :  { %v1794_v60 = vpop.f32.mrf.mxu2  ;;  %v1619_v42 = vpop.f32.mrf.mxu0 }
 0x20d   :  { %v1795_v40 = vadd.f32 %v1794_v60, %v1706_v21  ;;  %v1708_v22 = vpop.f32.mrf.mxu1  ;;  %v1620_v38 = vadd.f32 %v1619_v42, %v3963_v43 }
 0x20f   :  { %v1858_v28 = vmax.f32 %v1795_v40, 0.0  ;;  %1658 = vmatmul.bf16.gmra.mxu0 %v3123_v23  ;;  %v1709_v53 = vadd.f32 %v1708_v22, %v1620_v38 }
 0x210   :  { %1747 = vmatmul.bf16.gmra.mxu1 %v3127_v7 }
 0x211   :  { %v1884_v30 = vpack.c.bf16 %v1858_v28, %v1857_v10  ;;  %1836 = vmatmul.bf16.gmra.mxu2 %v3131_v25 }
 0x213   :  { %1996 = vmatmul.bf16.gmra.mxu3 %v1884_v30 }
 0x214   :  { %v1797_v33 = vpop.f32.mrf.mxu2  ;;  %v1621_v45 = vpop.f32.mrf.mxu0 }
 0x215   :  { %v1710_v46 = vpop.f32.mrf.mxu1  ;;  %v1622_v16 = vadd.f32 %v1621_v45, %v1533_v62  ;;  %v1798_v54 = vadd.f32 %v1797_v33, %v1709_v53 }
 0x217   :  { %v1711_v3 = vadd.f32 %v1710_v46, %v1622_v16  ;;  %v1859_v43 = vmax.f32 %v1798_v54, 0.0 }
 0x21c   :  { %v1799_v4 = vpop.f32.mrf.mxu2  ;;  %v1624_v11 = vpop.f32.mrf.mxu0 }
 0x21d   :  { %v1800_v8 = vadd.f32 %v1799_v4, %v1711_v3  ;;  %v1713_v55 = vpop.f32.mrf.mxu1  ;;  %v1625_v39 = vadd.f32 %v1624_v11, %v3971_v14 }
 0x21f   :  { %v1860_v29 = vmax.f32 %v1800_v8, 0.0  ;;  %1663 = vmatmul.bf16.gmra.mxu0 %v3151_v2  ;;  %v1714_v23 = vadd.f32 %v1713_v55, %v1625_v39 }
 0x220   :  { %1752 = vmatmul.bf16.gmra.mxu1 %v3155_v6 }
 0x221   :  { %v1885_v17 = vpack.c.bf16 %v1860_v29, %v1859_v43  ;;  %1841 = vmatmul.bf16.gmra.mxu2 %v3159_v59 }
 0x223   :  { %2001 = vmatmul.bf16.gmra.mxu3 %v1885_v17 }
 0x224   :  { %v1802_v63 = vpop.f32.mrf.mxu2  ;;  %v1626_v15 = vpop.f32.mrf.mxu0 }
 0x225   :  { %v1715_v21 = vpop.f32.mrf.mxu1  ;;  %v1627_v60 = vadd.f32 %v1626_v15, %v1538_v12  ;;  %v1803_v7 = vadd.f32 %v1802_v63, %v1714_v23 }
 0x227   :  { %v1716_v40 = vadd.f32 %v1715_v21, %v1627_v60  ;;  %v1861_v28 = vmax.f32 %v1803_v7, 0.0 }
 0x22c   :  { %v1804_v42 = vpop.f32.mrf.mxu2  ;;  %v1629_v25 = vpop.f32.mrf.mxu0 }
 0x22d   :  { %v1805_v22 = vadd.f32 %v1804_v42, %v1716_v40  ;;  %v1718_v10 = vpop.f32.mrf.mxu1  ;;  %v1630_v14 = vadd.f32 %v1629_v25, %v3979_v47  ;;  %v4067_v47 = vld [vmem:[%s4162_s4] ss:$0 sm:$0xff]  ;;  %v1553_v25 = vadd.f32 %v3997_v9, %v3999_v13 }
 0x22f   :  { %v1862_v30 = vmax.f32 %v1805_v22, 0.0  ;;  %v1719_v46 = vadd.f32 %v1718_v10, %v1630_v14 }
 0x231   :  { %v1886_v33 = vpack.c.bf16 %v1862_v30, %v1861_v28 }
 0x233   :  { %2006 = vmatmul.bf16.gmra.mxu3 %v1886_v33 }
 0x234   :  { %v1807_v62 = vpop.f32.mrf.mxu2  ;;  %v1631_v31 = vpop.f32.mrf.mxu0 }
 0x235   :  { %v1720_v38 = vpop.f32.mrf.mxu1  ;;  %v1632_v45 = vadd.f32 %v1631_v31, %v1543_v26  ;;  %v1808_v16 = vadd.f32 %v1807_v62, %v1719_v46 }
 0x237   :  { %v1721_v48 = vadd.f32 %v1720_v38, %v1632_v45  ;;  %v1863_v52 = vmax.f32 %v1808_v16, 0.0 }
 0x23c   :  { %v1809_v53 = vpop.f32.mrf.mxu2  ;;  %v1634_v41 = vpop.f32.mrf.mxu0 }
 0x23d   :  { %v1810_v56 = vadd.f32 %v1809_v53, %v1721_v48  ;;  %v1723_v49 = vpop.f32.mrf.mxu1  ;;  %v1635_v4 = vadd.f32 %v1634_v41, %v3987_v19 }
 0x23f   :  { %v1864_v54 = vmax.f32 %v1810_v56, 0.0  ;;  %v1724_v59 = vadd.f32 %v1723_v49, %v1635_v4 }
 0x241   :  { %v1887_v3 = vpack.c.bf16 %v1864_v54, %v1863_v52 }
 0x243   :  { %2011 = vmatmul.bf16.gmra.mxu3 %v1887_v3 }
 0x244   :  { %v1812_v61 = vpop.f32.mrf.mxu2  ;;  %v1636_v2 = vpop.f32.mrf.mxu0 }
 0x245   :  { %v1725_v6 = vpop.f32.mrf.mxu1  ;;  %v1637_v11 = vadd.f32 %v1636_v2, %v1548_v1  ;;  %v1813_v29 = vadd.f32 %v1812_v61, %v1724_v59 }
 0x246   :  { %v1972_v8 = vpop.f32.mrf.mxu3 }
 0x247   :  { %v1973_v55 = vadd.f32 %v4067_v47, %v1972_v8  ;;  %v1726_v17 = vadd.f32 %v1725_v6, %v1637_v11  ;;  %v1865_v60 = vmax.f32 %v1813_v29, 0.0 }
 0x249   :  { %v3416_v43 = vmul.f32 -1.442695, %v1973_v55 }
 0x24b   :  { %3636 = vpow2.f32 %v3416_v43 }
 0x24c   :  { %v1814_v63 = vpop.f32.mrf.mxu2  ;;  %v1639_v39 = vpop.f32.mrf.mxu0 }
 0x24d   :  { %v1815_v12 = vadd.f32 %v1814_v63, %v1726_v17  ;;  %v1728_v15 = vpop.f32.mrf.mxu1  ;;  %v1640_v42 = vadd.f32 %v1639_v39, %v3995_v57  ;;  %v1558_v39 = vadd.f32 %v4005_v51, %v4007_v58 }
 0x24e   :  { %v1974_v21 = vpop.f32.mrf.mxu3 }
 0x24f   :  { %v1866_v34 = vmax.f32 %v1815_v12, 0.0  ;;  %v1975_v19 = vadd.f32 %v4067_v47, %v1974_v21  ;;  %v1729_v26 = vadd.f32 %v1728_v15, %v1640_v42 }
 0x251   :  { %v3637_v37 = vpop.eup %3636  ;;  %v1888_v23 = vpack.c.bf16 %v1866_v34, %v1865_v60  ;;  %v3417_v7 = vmul.f32 -1.442695, %v1975_v19 }
 0x252   :  { %v2148_v40 = vadd.f32 1.0, %v3637_v37 }
 0x253   :  { %3638 = vpow2.f32 %v3417_v7  ;;  %2016 = vmatmul.bf16.gmra.mxu3 %v1888_v23 }
 0x254   :  { %3640 = vrcp.f32 %v2148_v40  ;;  %v1817_v22 = vpop.f32.mrf.mxu2  ;;  %v1641_v10 = vpop.f32.mrf.mxu0  ;;  %v2189_v41 = vand.u32 2147483647, %v2148_v40  ;;  %v2191_v49 = vand.u32 2147483648, %v2148_v40  ;;  %vm2185_vm1 = vweird.f32 %v2148_v40 }
 0x255   :  { %v1730_v28 = vpop.f32.mrf.mxu1  ;;  %v1642_v33 = vadd.f32 %v1641_v10, %v1553_v25  ;;  %v1818_v46 = vadd.f32 %v1817_v22, %v1729_v26 }
 0x256   :  { %v1977_v30 = vpop.f32.mrf.mxu3  ;;  %v2192_v55 = vor.u32 1.1754944e-38, %v2191_v49  ;;  %vm2190_vm3 = vcmp.eq.f32.partialorder %v2189_v41, 8.507059e+37 }
 0x257   :  { %v1978_v62 = vadd.f32 %v4067_v47, %v1977_v30  ;;  %v1731_v48 = vadd.f32 %v1730_v28, %v1642_v33  ;;  %v1867_v52 = vmax.f32 %v1818_v46, 0.0 }
 0x259   :  { %v3639_v14 = vpop.eup %3638  ;;  %v3418_v31 = vmul.f32 -1.442695, %v1978_v62 }
 0x25a   :  { %v3641_v38 = vpop.eup %3640  ;;  %v2149_v45 = vadd.f32 1.0, %v3639_v14 }
 0x25b   :  { %v2181_v16 = vmul.f32 %v3641_v38, %v2148_v40  ;;  %3642 = vpow2.f32 %v3418_v31  ;;  %vm2186_vm0 = vweird.f32 %v3641_v38 }
 0x25c   :  { %3644 = vrcp.f32 %v2149_v45  ;;  %v1819_v57 = vpop.f32.mrf.mxu2  ;;  %v1644_v9 = vpop.f32.mrf.mxu0  ;;  %vm2187_vm2 = vmor %vm2185_vm1, %vm2186_vm0  ;;  %v2204_v34 = vand.u32 2147483647, %v2149_v45  ;;  %v2206_v19 = vand.u32 2147483648, %v2149_v45  ;;  %vm2200_vm5 = vweird.f32 %v2149_v45 }
 0x25d   :  { %v2182_v53 = vsub.f32 1.0, %v2181_v16  ;;  %v1820_v56 = vadd.f32 %v1819_v57, %v1731_v48  ;;  %v1733_v13 = vpop.f32.mrf.mxu1  ;;  %v1645_v63 = vadd.f32 %v1644_v9, %v4003_v36 }
 0x25e   :  { %v1979_v54 = vpop.f32.mrf.mxu3  ;;  %vm2205_vm7 = vcmp.eq.f32.partialorder %v2204_v34, 8.507059e+37  ;;  %v2207_v51 = vor.u32 1.1754944e-38, %v2206_v19 }
 0x25f   :  { %v2183_v3 = vmul.f32 %v3641_v38, %v2182_v53  ;;  %v1868_v61 = vmax.f32 %v1820_v56, 0.0  ;;  %v1980_v1 = vadd.f32 %v4067_v47, %v1979_v54  ;;  %v1734_v42 = vadd.f32 %v1733_v13, %v1645_v63 }
 0x261   :  { %v3643_v4 = vpop.eup %3642  ;;  %v2184_v2 = vadd.f32 %v3641_v38, %v2183_v3  ;;  %v1889_v6 = vpack.c.bf16 %v1868_v61, %v1867_v52  ;;  %v3419_v8 = vmul.f32 -1.442695, %v1980_v1 }
 0x262   :  { %v3645_v11 = vpop.eup %3644  ;;  %v4079_v59 = vadd.f32 1.0, %v3643_v4 }
 0x263   :  { %v2188_v43 = vsel %vm2187_vm2, %v3641_v38, %v2184_v2  ;;  %v2196_v29 = vmul.f32 %v3645_v11, %v2149_v45  ;;  %3646 = vpow2.f32 %v3419_v8  ;;  %2021 = vmatmul.bf16.gmra.mxu3 %v1889_v6  ;;  %vm2201_vm4 = vweird.f32 %v3645_v11 }
 0x264   :  { %v2193_v17 = vsel %vm2190_vm3, %v2192_v55, %v2188_v43  ;;  %3648 = vrcp.f32 %v4079_v59  ;;  %v1822_v12 = vpop.f32.mrf.mxu2  ;;  %v1646_v21 = vpop.f32.mrf.mxu0  ;;  %vm2202_vm6 = vmor %vm2200_vm5, %vm2201_vm4  ;;  %v2219_v16 = vand.u32 2147483647, %v4079_v59  ;;  %v2221_v48 = vand.u32 2147483648, %v4079_v59 }
 0x265   :  { %2660 = vst [vmem:[#allocation8] sm:$0xff] %v2193_v17  ;;  %v2197_v15 = vsub.f32 1.0, %v2196_v29  ;;  %v1735_v60 = vpop.f32.mrf.mxu1  ;;  %v1647_v7 = vadd.f32 %v1646_v21, %v1558_v39  ;;  %v1823_v28 = vadd.f32 %v1822_v12, %v1734_v42  ;;  %vm2215_vm9 = vweird.f32 %v4079_v59 }
 0x266   :  { %v1982_v37 = vpop.f32.mrf.mxu3  ;;  %v2222_v61 = vor.u32 1.1754944e-38, %v2221_v48  ;;  %vm2220_vm11 = vcmp.eq.f32.partialorder %v2219_v16, 8.507059e+37  ;;  %v1563_v55 = vadd.f32 %v4013_v35, %v4015_v44 }
 0x267   :  { %v2198_v23 = vmul.f32 %v3645_v11, %v2197_v15  ;;  %v1983_v40 = vadd.f32 %v4067_v47, %v1982_v37  ;;  %v1736_v62 = vadd.f32 %v1735_v60, %v1647_v7  ;;  %v1869_v57 = vmax.f32 %v1823_v28, 0.0 }
 0x269   :  { %v3647_v22 = vpop.eup %3646  ;;  %v2199_v25 = vadd.f32 %v3645_v11, %v2198_v23  ;;  %v3420_v36 = vmul.f32 -1.442695, %v1983_v40 }
 0x26a   :  { %v3649_v10 = vpop.eup %3648  ;;  %v2151_v58 = vadd.f32 1.0, %v3647_v22 }
 0x26b   :  { %v2203_v30 = vsel %vm2202_vm6, %v3645_v11, %v2199_v25  ;;  %v2211_v33 = vmul.f32 %v3649_v10, %v4079_v59  ;;  %3650 = vpow2.f32 %v3420_v36  ;;  %vm2216_vm8 = vweird.f32 %v3649_v10 }
 0x26c   :  { %v2208_v26 = vsel %vm2205_vm7, %v2207_v51, %v2203_v30  ;;  %3652 = vrcp.f32 %v2151_v58  ;;  %v1824_v14 = vpop.f32.mrf.mxu2  ;;  %v1649_v46 = vpop.f32.mrf.mxu0  ;;  %vm2217_vm10 = vmor %vm2215_vm9, %vm2216_vm8  ;;  %v2234_v17 = vand.u32 2147483647, %v2151_v58  ;;  %v2236_v63 = vand.u32 2147483648, %v2151_v58 }
 0x26d   :  { %2661 = vst [vmem:[#allocation8 + $0x8] sm:$0xff] %v2208_v26  ;;  %v2212_v31 = vsub.f32 1.0, %v2211_v33  ;;  %v1825_v38 = vadd.f32 %v1824_v14, %v1736_v62  ;;  %v1738_v45 = vpop.f32.mrf.mxu1  ;;  %v1650_v8 = vadd.f32 %v1649_v46, %v4011_v18  ;;  %vm2230_vm13 = vweird.f32 %v2151_v58 }
 0x26e   :  { %v1984_v53 = vpop.f32.mrf.mxu3  ;;  %vm2235_vm15 = vcmp.eq.f32.partialorder %v2234_v17, 8.507059e+37  ;;  %v2237_v35 = vor.u32 1.1754944e-38, %v2236_v63 }
 0x26f   :  { %v2213_v56 = vmul.f32 %v3649_v10, %v2212_v31  ;;  %v1870_v9 = vmax.f32 %v1825_v38, 0.0  ;;  %v1985_v13 = vadd.f32 %v4067_v47, %v1984_v53  ;;  %v1739_v60 = vadd.f32 %v1738_v45, %v1650_v8 }
 0x271   :  { %v3651_v41 = vpop.eup %3650  ;;  %v2214_v49 = vadd.f32 %v3649_v10, %v2213_v56  ;;  %v1890_v52 = vpack.c.bf16 %v1870_v9, %v1869_v57  ;;  %v3421_v54 = vmul.f32 -1.442695, %v1985_v13 }
 0x272   :  { %v3653_v3 = vpop.eup %3652  ;;  %v4091_v1 = vadd.f32 1.0, %v3651_v41 }
 0x273   :  { %v2218_v4 = vsel %vm2217_vm10, %v3649_v10, %v2214_v49  ;;  %v2226_v2 = vmul.f32 %v3653_v3, %v2151_v58  ;;  %3654 = vpow2.f32 %v3421_v54  ;;  %2026 = vmatmul.bf16.gmra.mxu3 %v1890_v52  ;;  %vm2231_vm12 = vweird.f32 %v3653_v3 }
 0x274   :  { %v2223_v6 = vsel %vm2220_vm11, %v2222_v61, %v2218_v4  ;;  %3656 = vrcp.f32 %v4091_v1  ;;  %v1827_v11 = vpop.f32.mrf.mxu2  ;;  %v1651_v43 = vpop.f32.mrf.mxu0  ;;  %vm2232_vm14 = vmor %vm2230_vm13, %vm2231_vm12  ;;  %v2249_v28 = vand.u32 2147483647, %v4091_v1  ;;  %v2251_v30 = vand.u32 2147483648, %v4091_v1 }
 0x275   :  { %2662 = vst [vmem:[#allocation8 + $0x10] sm:$0xff] %v2223_v6  ;;  %v2227_v59 = vsub.f32 1.0, %v2226_v2  ;;  %v1740_v29 = vpop.f32.mrf.mxu1  ;;  %v1652_v15 = vadd.f32 %v1651_v43, %v1563_v55  ;;  %v1828_v23 = vadd.f32 %v1827_v11, %v1739_v60  ;;  %vm2245_vm1 = vweird.f32 %v4091_v1 }
 0x276   :  { %v1987_v12 = vpop.f32.mrf.mxu3  ;;  %v2252_v57 = vor.u32 1.1754944e-38, %v2251_v30  ;;  %vm2250_vm3 = vcmp.eq.f32.partialorder %v2249_v28, 8.507059e+37  ;;  %v1568_v52 = vadd.f32 %v4021_v24, %v4023_v32 }
 0x277   :  { %v2228_v39 = vmul.f32 %v3653_v3, %v2227_v59  ;;  %v1988_v21 = vadd.f32 %v4067_v47, %v1987_v12  ;;  %v1741_v42 = vadd.f32 %v1740_v29, %v1652_v15  ;;  %v1871_v33 = vmax.f32 %v1828_v23, 0.0 }
 0x279   :  { %v3655_v34 = vpop.eup %3654  ;;  %v2229_v19 = vadd.f32 %v3653_v3, %v2228_v39  ;;  %v3422_v18 = vmul.f32 -1.442695, %v1988_v21 }
 0x27a   :  { %v3657_v37 = vpop.eup %3656  ;;  %v2153_v44 = vadd.f32 1.0, %v3655_v34 }
 0x27b   :  { %v2233_v7 = vsel %vm2232_vm14, %v3653_v3, %v2229_v19  ;;  %v2241_v40 = vmul.f32 %v3657_v37, %v4091_v1  ;;  %3658 = vpow2.f32 %v3422_v18  ;;  %vm2246_vm0 = vweird.f32 %v3657_v37 }
 0x27c   :  { %v2238_v22 = vsel %vm2235_vm15, %v2237_v35, %v2233_v7  ;;  %3660 = vrcp.f32 %v2153_v44  ;;  %v1829_v25 = vpop.f32.mrf.mxu2  ;;  %v1654_v51 = vpop.f32.mrf.mxu0  ;;  %vm2247_vm2 = vmor %vm2245_vm1, %vm2246_vm0  ;;  %v2264_v1 = vand.u32 2147483647, %v2153_v44  ;;  %v2266_v4 = vand.u32 2147483648, %v2153_v44 }
 0x27d   :  { %2663 = vst [vmem:[#allocation8 + $0x18] sm:$0xff] %v2238_v22  ;;  %v2242_v36 = vsub.f32 1.0, %v2241_v40  ;;  %v1830_v10 = vadd.f32 %v1829_v25, %v1741_v42  ;;  %v1743_v58 = vpop.f32.mrf.mxu1  ;;  %v1655_v41 = vadd.f32 %v1654_v51, %v4019_v5  ;;  %vm2260_vm5 = vweird.f32 %v2153_v44 }
 0x27e   :  { %v1989_v62 = vpop.f32.mrf.mxu3  ;;  %vm2265_vm7 = vcmp.eq.f32.partialorder %v2264_v1, 8.507059e+37  ;;  %v2267_v24 = vor.u32 1.1754944e-38, %v2266_v4 }
 0x27f   :  { %v2243_v26 = vmul.f32 %v3657_v37, %v2242_v36  ;;  %v1872_v14 = vmax.f32 %v1830_v10, 0.0  ;;  %v1990_v31 = vadd.f32 %v4067_v47, %v1989_v62  ;;  %v1744_v55 = vadd.f32 %v1743_v58, %v1655_v41 }
 0x281   :  { %v3659_v38 = vpop.eup %3658  ;;  %v2244_v46 = vadd.f32 %v3657_v37, %v2243_v26  ;;  %v1891_v45 = vpack.c.bf16 %v1872_v14, %v1871_v33  ;;  %v3423_v16 = vmul.f32 -1.442695, %v1990_v31  ;;  %v1573_v31 = vadd.f32 %v4029_v20, %v4031_v27 }
 0x282   :  { %v3661_v48 = vpop.eup %3660  ;;  %v4103_v53 = vadd.f32 1.0, %v3659_v38 }
 0x283   :  { %v2248_v56 = vsel %vm2247_vm2, %v3657_v37, %v2244_v46  ;;  %v2256_v9 = vmul.f32 %v3661_v48, %v2153_v44  ;;  %3662 = vpow2.f32 %v3423_v16  ;;  %2031 = vmatmul.bf16.gmra.mxu3 %v1891_v45  ;;  %vm2261_vm4 = vweird.f32 %v3661_v48 }
 0x284   :  { %v2253_v13 = vsel %vm2250_vm3, %v2252_v57, %v2248_v56  ;;  %3664 = vrcp.f32 %v4103_v53  ;;  %v1832_v49 = vpop.f32.mrf.mxu2  ;;  %v1656_v3 = vpop.f32.mrf.mxu0  ;;  %vm2262_vm6 = vmor %vm2260_vm5, %vm2261_vm4  ;;  %v2279_v37 = vand.u32 2147483647, %v4103_v53  ;;  %v2281_v35 = vand.u32 2147483648, %v4103_v53 }
 0x285   :  { %2664 = vst [vmem:[#allocation8 + $0x20] sm:$0xff] %v2253_v13  ;;  %v2257_v54 = vsub.f32 1.0, %v2256_v9  ;;  %v1745_v61 = vpop.f32.mrf.mxu1  ;;  %v1657_v8 = vadd.f32 %v1656_v3, %v1568_v52  ;;  %v1833_v17 = vadd.f32 %v1832_v49, %v1744_v55  ;;  %vm2275_vm9 = vweird.f32 %v4103_v53 }
 0x286   :  { %v1992_v2 = vpop.f32.mrf.mxu3  ;;  %v2282_v58 = vor.u32 1.1754944e-38, %v2281_v35  ;;  %vm2280_vm11 = vcmp.eq.f32.partialorder %v2279_v37, 8.507059e+37  ;;  %v4166_v35 = vld [vmem:[#allocation12_spill] sm:$0xff] }
 0x287   :  { %v2258_v6 = vmul.f32 %v3661_v48, %v2257_v54  ;;  %v1993_v11 = vadd.f32 %v4067_v47, %v1992_v2  ;;  %v1746_v39 = vadd.f32 %v1745_v61, %v1657_v8  ;;  %v1873_v44 = vmax.f32 %v1833_v17, 0.0 }
 0x289   :  { %v3663_v59 = vpop.eup %3662  ;;  %v2259_v43 = vadd.f32 %v3661_v48, %v2258_v6  ;;  %v3424_v5 = vmul.f32 -1.442695, %v1993_v11 }
 0x28a   :  { %v3665_v29 = vpop.eup %3664  ;;  %v2155_v32 = vadd.f32 1.0, %v3663_v59 }
 0x28b   :  { %v2263_v63 = vsel %vm2262_vm6, %v3661_v48, %v2259_v43  ;;  %v2271_v12 = vmul.f32 %v3665_v29, %v4103_v53  ;;  %3666 = vpow2.f32 %v3424_v5  ;;  %vm2276_vm8 = vweird.f32 %v3665_v29 }
 0x28c   :  { %v2268_v15 = vsel %vm2265_vm7, %v2267_v24, %v2263_v63  ;;  %3668 = vrcp.f32 %v2155_v32  ;;  %v1834_v21 = vpop.f32.mrf.mxu2  ;;  %v1659_v19 = vpop.f32.mrf.mxu0  ;;  %vm2277_vm10 = vmor %vm2275_vm9, %vm2276_vm8  ;;  %v2294_v45 = vand.u32 2147483647, %v2155_v32  ;;  %v2296_v16 = vand.u32 2147483648, %v2155_v32 }
 0x28d   :  { %2665 = vst [vmem:[#allocation8 + $0x28] sm:$0xff] %v2268_v15  ;;  %v2272_v60 = vsub.f32 1.0, %v2271_v12  ;;  %v1835_v34 = vadd.f32 %v1834_v21, %v1746_v39  ;;  %v1748_v18 = vpop.f32.mrf.mxu1  ;;  %v1660_v26 = vadd.f32 %v1659_v19, %v4027_v0  ;;  %vm2290_vm13 = vweird.f32 %v2155_v32 }
 0x28e   :  { %v1994_v23 = vpop.f32.mrf.mxu3  ;;  %vm2295_vm15 = vcmp.eq.f32.partialorder %v2294_v45, 8.507059e+37  ;;  %v2297_v20 = vor.u32 1.1754944e-38, %v2296_v16 }
 0x28f   :  { %v2273_v7 = vmul.f32 %v3665_v29, %v2272_v60  ;;  %v1874_v40 = vmax.f32 %v1835_v34, 0.0  ;;  %v1995_v42 = vadd.f32 %v4067_v47, %v1994_v23  ;;  %v1749_v13 = vadd.f32 %v1748_v18, %v1660_v26 }
 0x291   :  { %v3667_v22 = vpop.eup %3666  ;;  %v2274_v25 = vadd.f32 %v3665_v29, %v2273_v7  ;;  %v1892_v36 = vpack.c.bf16 %v1874_v40, %v1873_v44  ;;  %v3425_v10 = vmul.f32 -1.442695, %v1995_v42  ;;  %v4167_v7 = vld [vmem:[#allocation13_spill] sm:$0xff] }
 0x292   :  { %v3669_v51 = vpop.eup %3668  ;;  %v4115_v28 = vadd.f32 1.0, %v3667_v22  ;;  %v1578_v40 = vadd.f32 %v4062_v50, %v4167_v7 }
 0x293   :  { %v2278_v30 = vsel %vm2277_vm10, %v3665_v29, %v2274_v25  ;;  %v2286_v33 = vmul.f32 %v3669_v51, %v2155_v32  ;;  %3670 = vpow2.f32 %v3425_v10  ;;  %2036 = vmatmul.bf16.gmra.mxu3 %v1892_v36  ;;  %vm2291_vm12 = vweird.f32 %v3669_v51 }
 0x294   :  { %v2283_v62 = vsel %vm2280_vm11, %v2282_v58, %v2278_v30  ;;  %3672 = vrcp.f32 %v4115_v28  ;;  %v1837_v14 = vpop.f32.mrf.mxu2  ;;  %v1661_v46 = vpop.f32.mrf.mxu0  ;;  %vm2292_vm14 = vmor %vm2290_vm13, %vm2291_vm12  ;;  %v2309_v55 = vand.u32 2147483647, %v4115_v28  ;;  %v2311_v59 = vand.u32 2147483648, %v4115_v28 }
 0x295   :  { %2666 = vst [vmem:[#allocation8 + $0x30] sm:$0xff] %v2283_v62  ;;  %v2287_v38 = vsub.f32 1.0, %v2286_v33  ;;  %v1750_v48 = vpop.f32.mrf.mxu1  ;;  %v1662_v56 = vadd.f32 %v1661_v46, %v1573_v31  ;;  %v1838_v54 = vadd.f32 %v1837_v14, %v1749_v13  ;;  %vm2305_vm1 = vweird.f32 %v4115_v28 }
 0x296   :  { %v1997_v57 = vpop.f32.mrf.mxu3  ;;  %v2312_v60 = vor.u32 1.1754944e-38, %v2311_v59  ;;  %vm2310_vm3 = vcmp.eq.f32.partialorder %v2309_v55, 8.507059e+37 }
 0x297   :  { %v2288_v53 = vmul.f32 %v3669_v51, %v2287_v38  ;;  %v1998_v9 = vadd.f32 %v4067_v47, %v1997_v57  ;;  %v1751_v1 = vadd.f32 %v1750_v48, %v1662_v56  ;;  %v1875_v43 = vmax.f32 %v1838_v54, 0.0 }
 0x299   :  { %v3671_v41 = vpop.eup %3670  ;;  %v2289_v49 = vadd.f32 %v3669_v51, %v2288_v53  ;;  %v3426_v0 = vmul.f32 -1.442695, %v1998_v9 }
 0x29a   :  { %v3673_v52 = vpop.eup %3672  ;;  %v2157_v27 = vadd.f32 1.0, %v3671_v41 }
 0x29b   :  { %v2293_v3 = vsel %vm2292_vm14, %v3669_v51, %v2289_v49  ;;  %v2301_v61 = vmul.f32 %v3673_v52, %v4115_v28  ;;  %3674 = vpow2.f32 %v3426_v0  ;;  %vm2306_vm0 = vweird.f32 %v3673_v52 }
 0x29c   :  { %v2298_v4 = vsel %vm2295_vm15, %v2297_v20, %v2293_v3  ;;  %3676 = vrcp.f32 %v2157_v27  ;;  %v1839_v2 = vpop.f32.mrf.mxu2  ;;  %v1664_v11 = vpop.f32.mrf.mxu0  ;;  %vm2307_vm2 = vmor %vm2305_vm1, %vm2306_vm0  ;;  %v2324_v25 = vand.u32 2147483647, %v2157_v27  ;;  %v2326_v36 = vand.u32 2147483648, %v2157_v27 }
 0x29d   :  { %2667 = vst [vmem:[#allocation8 + $0x38] sm:$0xff] %v2298_v4  ;;  %v2302_v6 = vsub.f32 1.0, %v2301_v61  ;;  %v1840_v8 = vadd.f32 %v1839_v2, %v1751_v1  ;;  %v1753_v17 = vpop.f32.mrf.mxu1  ;;  %v1665_v44 = vadd.f32 %v1664_v11, %v4166_v35  ;;  %vm2320_vm5 = vweird.f32 %v2157_v27 }
 0x29e   :  { %v1999_v5 = vpop.f32.mrf.mxu3  ;;  %vm2325_vm7 = vcmp.eq.f32.partialorder %v2324_v25, 8.507059e+37  ;;  %v2327_v50 = vor.u32 1.1754944e-38, %v2326_v36 }
 0x29f   :  { %v2303_v29 = vmul.f32 %v3673_v52, %v2302_v6  ;;  %v1876_v24 = vmax.f32 %v1840_v8, 0.0  ;;  %v2000_v32 = vadd.f32 %v4067_v47, %v1999_v5  ;;  %v1754_v30 = vadd.f32 %v1753_v17, %v1665_v44 }
 0x2a1   :  { %v3675_v63 = vpop.eup %3674  ;;  %v2304_v12 = vadd.f32 %v3673_v52, %v2303_v29  ;;  %v1893_v39 = vpack.c.bf16 %v1876_v24, %v1875_v43  ;;  %v3427_v15 = vmul.f32 -1.442695, %v2000_v32 }
 0x2a2   :  { %v3677_v21 = vpop.eup %3676  ;;  %v2158_v34 = vadd.f32 1.0, %v3675_v63 }
 0x2a3   :  { %v2308_v19 = vsel %vm2307_vm2, %v3673_v52, %v2304_v12  ;;  %v2316_v18 = vmul.f32 %v3677_v21, %v2157_v27  ;;  %3678 = vpow2.f32 %v3427_v15  ;;  %2041 = vmatmul.bf16.gmra.mxu3 %v1893_v39  ;;  %vm2321_vm4 = vweird.f32 %v3677_v21 }
 0x2a4   :  { %v2313_v37 = vsel %vm2310_vm3, %v2312_v60, %v2308_v19  ;;  %3680 = vrcp.f32 %v2158_v34  ;;  %v1842_v23 = vpop.f32.mrf.mxu2  ;;  %v1666_v22 = vpop.f32.mrf.mxu0  ;;  %vm2322_vm6 = vmor %vm2320_vm5, %vm2321_vm4  ;;  %v2339_v13 = vand.u32 2147483647, %v2158_v34  ;;  %v2341_v41 = vand.u32 2147483648, %v2158_v34 }
 0x2a5   :  { %2668 = vst [vmem:[#allocation8 + $0x40] sm:$0xff] %v2313_v37  ;;  %v2317_v42 = vsub.f32 1.0, %v2316_v18  ;;  %v1667_v58 = vadd.f32 %v1666_v22, %v1578_v40  ;;  %v1843_v38 = vadd.f32 %v1842_v23, %v1754_v30  ;;  %v1755_v46 = vpop.f32.mrf.mxu1  ;;  %vm2335_vm9 = vweird.f32 %v2158_v34 }
 0x2a6   :  { %v2002_v10 = vpop.f32.mrf.mxu3  ;;  %v2342_v2 = vor.u32 1.1754944e-38, %v2341_v41  ;;  %vm2340_vm11 = vcmp.eq.f32.partialorder %v2339_v13, 8.507059e+37 }
 0x2a7   :  { %v2318_v51 = vmul.f32 %v3677_v21, %v2317_v42  ;;  %v2003_v28 = vadd.f32 %v4067_v47, %v2002_v10  ;;  %v1756_v48 = vadd.f32 %v1755_v46, %v1667_v58  ;;  %v1877_v49 = vmax.f32 %v1843_v38, 0.0 }
 0x2a9   :  { %v3679_v33 = vpop.eup %3678  ;;  %v2319_v62 = vadd.f32 %v3677_v21, %v2318_v51  ;;  %v3428_v26 = vmul.f32 -1.442695, %v2003_v28 }
 0x2aa   :  { %v3681_v14 = vpop.eup %3680  ;;  %v2159_v31 = vadd.f32 1.0, %v3679_v33 }
 0x2ab   :  { %v2323_v45 = vsel %vm2322_vm6, %v3677_v21, %v2319_v62  ;;  %v2331_v16 = vmul.f32 %v3681_v14, %v2158_v34  ;;  %3682 = vpow2.f32 %v3428_v26  ;;  %vm2336_vm8 = vweird.f32 %v3681_v14 }
 0x2ac   :  { %v2328_v57 = vsel %vm2325_vm7, %v2327_v50, %v2323_v45  ;;  %3684 = vrcp.f32 %v2159_v31  ;;  %v1844_v53 = vpop.f32.mrf.mxu2  ;;  %vm2337_vm10 = vmor %vm2335_vm9, %vm2336_vm8  ;;  %v2356_v43 = vand.u32 2147483648, %v2159_v31  ;;  %v2354_v24 = vand.u32 2147483647, %v2159_v31 }
 0x2ad   :  { %2669 = vst [vmem:[#allocation8 + $0x48] sm:$0xff] %v2328_v57  ;;  %v2332_v56 = vsub.f32 1.0, %v2331_v16  ;;  %v1845_v9 = vadd.f32 %v1844_v53, %v1756_v48  ;;  %vm2350_vm13 = vweird.f32 %v2159_v31 }
 0x2ae   :  { %v2004_v0 = vpop.f32.mrf.mxu3  ;;  %v2357_v15 = vor.u32 1.1754944e-38, %v2356_v43  ;;  %vm2355_vm15 = vcmp.eq.f32.partialorder %v2354_v24, 8.507059e+37 }
 0x2af   :  { %v2333_v52 = vmul.f32 %v3681_v14, %v2332_v56  ;;  %v1878_v20 = vmax.f32 %v1845_v9, 0.0  ;;  %v2005_v27 = vadd.f32 %v4067_v47, %v2004_v0 }
 0x2b1   :  { %v3683_v54 = vpop.eup %3682  ;;  %v2334_v3 = vadd.f32 %v3681_v14, %v2333_v52  ;;  %v1894_v61 = vpack.c.bf16 %v1878_v20, %v1877_v49  ;;  %v3429_v1 = vmul.f32 -1.442695, %v2005_v27 }
 0x2b2   :  { %v3685_v4 = vpop.eup %3684  ;;  %v2160_v6 = vadd.f32 1.0, %v3683_v54 }
 0x2b3   :  { %v2338_v8 = vsel %vm2337_vm10, %v3681_v14, %v2334_v3  ;;  %v2346_v11 = vmul.f32 %v3685_v4, %v2159_v31  ;;  %3686 = vpow2.f32 %v3429_v1  ;;  %2046 = vmatmul.bf16.gmra.mxu3 %v1894_v61  ;;  %vm2351_vm12 = vweird.f32 %v3685_v4 }
 0x2b4   :  { %v2343_v55 = vsel %vm2340_vm11, %v2342_v2, %v2338_v8  ;;  %3688 = vrcp.f32 %v2160_v6  ;;  %vm2352_vm14 = vmor %vm2350_vm13, %vm2351_vm12  ;;  %v2371_v37 = vand.u32 2147483648, %v2160_v6  ;;  %v2369_v23 = vand.u32 2147483647, %v2160_v6 }
 0x2b5   :  { %2670 = vst [vmem:[#allocation8 + $0x50] sm:$0xff] %v2343_v55  ;;  %v2347_v59 = vsub.f32 1.0, %v2346_v11  ;;  %vm2365_vm1 = vweird.f32 %v2160_v6 }
 0x2b6   :  { %v2007_v5 = vpop.f32.mrf.mxu3  ;;  %v2372_v36 = vor.u32 1.1754944e-38, %v2371_v37  ;;  %vm2370_vm3 = vcmp.eq.f32.partialorder %v2369_v23, 8.507059e+37 }
 0x2b7   :  { %v2348_v29 = vmul.f32 %v3685_v4, %v2347_v59  ;;  %v2008_v32 = vadd.f32 %v4067_v47, %v2007_v5 }
 0x2b9   :  { %v3687_v17 = vpop.eup %3686  ;;  %v2349_v63 = vadd.f32 %v3685_v4, %v2348_v29  ;;  %v3430_v12 = vmul.f32 -1.442695, %v2008_v32 }
 0x2ba   :  { %v3689_v39 = vpop.eup %3688  ;;  %v2161_v21 = vadd.f32 1.0, %v3687_v17 }
 0x2bb   :  { %v2353_v60 = vsel %vm2352_vm14, %v3685_v4, %v2349_v63  ;;  %v2361_v34 = vmul.f32 %v3689_v39, %v2160_v6  ;;  %3690 = vpow2.f32 %v3430_v12  ;;  %vm2366_vm0 = vweird.f32 %v3689_v39 }
 0x2bc   :  { %v2358_v19 = vsel %vm2355_vm15, %v2357_v15, %v2353_v60  ;;  %3692 = vrcp.f32 %v2161_v21  ;;  %vm2367_vm2 = vmor %vm2365_vm1, %vm2366_vm0  ;;  %v2386_v33 = vand.u32 2147483648, %v2161_v21  ;;  %v2384_v14 = vand.u32 2147483647, %v2161_v21 }
 0x2bd   :  { %2671 = vst [vmem:[#allocation8 + $0x58] sm:$0xff] %v2358_v19  ;;  %v2362_v18 = vsub.f32 1.0, %v2361_v34  ;;  %vm2380_vm5 = vweird.f32 %v2161_v21 }
 0x2be   :  { %v2009_v35 = vpop.f32.mrf.mxu3  ;;  %v2387_v16 = vor.u32 1.1754944e-38, %v2386_v33  ;;  %vm2385_vm7 = vcmp.eq.f32.partialorder %v2384_v14, 8.507059e+37  ;;  %v4141_v33 = vld [vmem:[%s4162_s4] ss:$0 sm:$0xff]  ;;  %s3874_s4 = smov [#allocation8]  }
 0x2bf   :  { %v2363_v44 = vmul.f32 %v3689_v39, %v2362_v18  ;;  %v2010_v7 = vadd.f32 %v4067_v47, %v2009_v35  ;;  %s2696_s14 = sshll.u32 %s3874_s4, 4  ;;  %s2697_s14 = int_to_ptr.vmem [resolvable:$true] %s2696_s14 }
 0x2c1   :  { %v3691_v40 = vpop.eup %3690  ;;  %v2364_v42 = vadd.f32 %v3689_v39, %v2363_v44  ;;  %v3431_v22 = vmul.f32 -1.442695, %v2010_v7 }
 0x2c2   :  { %v3693_v25 = vpop.eup %3692  ;;  %v2162_v10 = vadd.f32 1.0, %v3691_v40 }
 0x2c3   :  { %v2368_v51 = vsel %vm2367_vm2, %v3689_v39, %v2364_v42  ;;  %v2376_v58 = vmul.f32 %v3693_v25, %v2161_v21  ;;  %3694 = vpow2.f32 %v3431_v22  ;;  %vm2381_vm4 = vweird.f32 %v3693_v25 }
 0x2c4   :  { %v2373_v28 = vsel %vm2370_vm3, %v2372_v36, %v2368_v51  ;;  %3696 = vrcp.f32 %v2162_v10  ;;  %vm2382_vm6 = vmor %vm2380_vm5, %vm2381_vm4  ;;  %v2401_v13 = vand.u32 2147483648, %v2162_v10  ;;  %v2399_v0 = vand.u32 2147483647, %v2162_v10 }
 0x2c5   :  { %2672 = vst [vmem:[#allocation8 + $0x60] sm:$0xff] %v2373_v28  ;;  %v2377_v30 = vsub.f32 1.0, %v2376_v58  ;;  %vm2395_vm9 = vweird.f32 %v2162_v10 }
 0x2c6   :  { %v2012_v62 = vpop.f32.mrf.mxu3  ;;  %v2402_v61 = vor.u32 1.1754944e-38, %v2401_v13  ;;  %vm2400_vm11 = vcmp.eq.f32.partialorder %v2399_v0, 8.507059e+37 }
 0x2c7   :  { %v2378_v26 = vmul.f32 %v3693_v25, %v2377_v30  ;;  %v2013_v50 = vadd.f32 %v4067_v47, %v2012_v62 }
 0x2c9   :  { %v3695_v31 = vpop.eup %3694  ;;  %v2379_v38 = vadd.f32 %v3693_v25, %v2378_v26  ;;  %v3432_v46 = vmul.f32 -1.442695, %v2013_v50 }
 0x2ca   :  { %v3697_v45 = vpop.eup %3696  ;;  %v2163_v48 = vadd.f32 1.0, %v3695_v31 }
 0x2cb   :  { %v2383_v57 = vsel %vm2382_vm6, %v3693_v25, %v2379_v38  ;;  %v2391_v53 = vmul.f32 %v3697_v45, %v2162_v10  ;;  %3698 = vpow2.f32 %v3432_v46  ;;  %vm2396_vm8 = vweird.f32 %v3697_v45 }
 0x2cc   :  { %v2388_v56 = vsel %vm2385_vm7, %v2387_v16, %v2383_v57  ;;  %3700 = vrcp.f32 %v2163_v48  ;;  %vm2397_vm10 = vmor %vm2395_vm9, %vm2396_vm8  ;;  %v2416_v11 = vand.u32 2147483648, %v2163_v48  ;;  %v2414_v43 = vand.u32 2147483647, %v2163_v48 }
 0x2cd   :  { %2673 = vst [vmem:[#allocation8 + $0x68] sm:$0xff] %v2388_v56  ;;  %v2392_v9 = vsub.f32 1.0, %v2391_v53  ;;  %vm2410_vm13 = vweird.f32 %v2163_v48 }
 0x2ce   :  { %v2014_v41 = vpop.f32.mrf.mxu3  ;;  %v2417_v63 = vor.u32 1.1754944e-38, %v2416_v11  ;;  %vm2415_vm15 = vcmp.eq.f32.partialorder %v2414_v43, 8.507059e+37 }
 0x2cf   :  { %v2393_v49 = vmul.f32 %v3697_v45, %v2392_v9  ;;  %v2015_v52 = vadd.f32 %v4067_v47, %v2014_v41 }
 0x2d1   :  { %v3699_v20 = vpop.eup %3698  ;;  %v2394_v27 = vadd.f32 %v3697_v45, %v2393_v49  ;;  %v3433_v54 = vmul.f32 -1.442695, %v2015_v52 }
 0x2d2   :  { %v3701_v3 = vpop.eup %3700  ;;  %v2164_v1 = vadd.f32 1.0, %v3699_v20 }
 0x2d3   :  { %v2398_v4 = vsel %vm2397_vm10, %v3697_v45, %v2394_v27  ;;  %v2406_v2 = vmul.f32 %v3701_v3, %v2163_v48  ;;  %3702 = vpow2.f32 %v3433_v54  ;;  %vm2411_vm12 = vweird.f32 %v3701_v3 }
 0x2d4   :  { %v2403_v6 = vsel %vm2400_vm11, %v2402_v61, %v2398_v4  ;;  %3704 = vrcp.f32 %v2164_v1  ;;  %vm2412_vm14 = vmor %vm2410_vm13, %vm2411_vm12  ;;  %v2431_v34 = vand.u32 2147483648, %v2164_v1  ;;  %v2429_v37 = vand.u32 2147483647, %v2164_v1 }
 0x2d5   :  { %2674 = vst [vmem:[#allocation8 + $0x70] sm:$0xff] %v2403_v6  ;;  %v2407_v8 = vsub.f32 1.0, %v2406_v2  ;;  %vm2425_vm1 = vweird.f32 %v2164_v1 }
 0x2d6   :  { %v2017_v55 = vpop.f32.mrf.mxu3  ;;  %v2432_v42 = vor.u32 1.1754944e-38, %v2431_v34  ;;  %vm2430_vm3 = vcmp.eq.f32.partialorder %v2429_v37, 8.507059e+37 }
 0x2d7   :  { %v2408_v59 = vmul.f32 %v3701_v3, %v2407_v8  ;;  %v2018_v5 = vadd.f32 %v4067_v47, %v2017_v55 }
 0x2d9   :  { %v3703_v29 = vpop.eup %3702  ;;  %v2409_v24 = vadd.f32 %v3701_v3, %v2408_v59  ;;  %v3434_v32 = vmul.f32 -1.442695, %v2018_v5 }
 0x2da   :  { %v3705_v17 = vpop.eup %3704  ;;  %v2165_v12 = vadd.f32 1.0, %v3703_v29 }
 0x2db   :  { %v2413_v39 = vsel %vm2412_vm14, %v3701_v3, %v2409_v24  ;;  %v2421_v15 = vmul.f32 %v3705_v17, %v2164_v1  ;;  %3706 = vpow2.f32 %v3434_v32  ;;  %vm2426_vm0 = vweird.f32 %v3705_v17 }
 0x2dc   :  { %v2418_v21 = vsel %vm2415_vm15, %v2417_v63, %v2413_v39  ;;  %3708 = vrcp.f32 %v2165_v12  ;;  %vm2427_vm2 = vmor %vm2425_vm1, %vm2426_vm0  ;;  %v2446_v58 = vand.u32 2147483648, %v2165_v12  ;;  %vm2440_vm5 = vweird.f32 %v2165_v12 }
 0x2dd   :  { %2675 = vst [vmem:[#allocation8 + $0x78] sm:$0xff] %v2418_v21  ;;  %v2422_v60 = vsub.f32 1.0, %v2421_v15 }
 0x2de   :  { %v2019_v19 = vpop.f32.mrf.mxu3  ;;  %v2447_v38 = vor.u32 1.1754944e-38, %v2446_v58 }
 0x2df   :  { %v2423_v18 = vmul.f32 %v3705_v17, %v2422_v60  ;;  %v2020_v35 = vadd.f32 %v4067_v47, %v2019_v19  ;;  %v2444_v47 = vand.u32 2147483647, %v2165_v12 }
 0x2e1   :  { %v3707_v44 = vpop.eup %3706  ;;  %v2424_v23 = vadd.f32 %v3705_v17, %v2423_v18  ;;  %v3435_v7 = vmul.f32 -1.442695, %v2020_v35  ;;  %vm2445_vm7 = vcmp.eq.f32.partialorder %v2444_v47, 8.507059e+37 }
 0x2e2   :  { %v3709_v40 = vpop.eup %3708  ;;  %v2166_v22 = vadd.f32 1.0, %v3707_v44 }
 0x2e3   :  { %v2428_v25 = vsel %vm2427_vm2, %v3705_v17, %v2424_v23  ;;  %v2436_v36 = vmul.f32 %v3709_v40, %v2165_v12  ;;  %3710 = vpow2.f32 %v3435_v7  ;;  %vm2441_vm4 = vweird.f32 %v3709_v40 }
 0x2e4   :  { %v2433_v10 = vsel %vm2430_vm3, %v2432_v42, %v2428_v25  ;;  %3712 = vrcp.f32 %v2166_v22  ;;  %vm2442_vm6 = vmor %vm2440_vm5, %vm2441_vm4  ;;  %v2461_v53 = vand.u32 2147483648, %v2166_v22  ;;  %v2459_v13 = vand.u32 2147483647, %v2166_v22 }
 0x2e5   :  { %2676 = vst [vmem:[#allocation8 + $0x80] sm:$0xff] %v2433_v10  ;;  %v2437_v51 = vsub.f32 1.0, %v2436_v36  ;;  %vm2455_vm9 = vweird.f32 %v2166_v22 }
 0x2e6   :  { %v2022_v28 = vpop.f32.mrf.mxu3  ;;  %v2462_v27 = vor.u32 1.1754944e-38, %v2461_v53  ;;  %vm2460_vm11 = vcmp.eq.f32.partialorder %v2459_v13, 8.507059e+37 }
 0x2e7   :  { %v2438_v30 = vmul.f32 %v3709_v40, %v2437_v51  ;;  %v2023_v62 = vadd.f32 %v4141_v33, %v2022_v28 }
 0x2e9   :  { %v3711_v26 = vpop.eup %3710  ;;  %v2439_v14 = vadd.f32 %v3709_v40, %v2438_v30  ;;  %v3436_v50 = vmul.f32 -1.442695, %v2023_v62 }
 0x2ea   :  { %v3713_v31 = vpop.eup %3712  ;;  %v2167_v46 = vadd.f32 1.0, %v3711_v26 }
 0x2eb   :  { %v2443_v45 = vsel %vm2442_vm6, %v3709_v40, %v2439_v14  ;;  %v2451_v16 = vmul.f32 %v3713_v31, %v2166_v22  ;;  %3714 = vpow2.f32 %v3436_v50  ;;  %vm2456_vm8 = vweird.f32 %v3713_v31 }
 0x2ec   :  { %v2448_v48 = vsel %vm2445_vm7, %v2447_v38, %v2443_v45  ;;  %3716 = vrcp.f32 %v2167_v46  ;;  %vm2457_vm10 = vmor %vm2455_vm9, %vm2456_vm8  ;;  %v2476_v2 = vand.u32 2147483648, %v2167_v46  ;;  %v2474_v11 = vand.u32 2147483647, %v2167_v46 }
 0x2ed   :  { %2677 = vst [vmem:[#allocation8 + $0x88] sm:$0xff] %v2448_v48  ;;  %v2452_v57 = vsub.f32 1.0, %v2451_v16  ;;  %vm2470_vm13 = vweird.f32 %v2167_v46 }
 0x2ee   :  { %v2024_v56 = vpop.f32.mrf.mxu3  ;;  %v2477_v24 = vor.u32 1.1754944e-38, %v2476_v2  ;;  %vm2475_vm15 = vcmp.eq.f32.partialorder %v2474_v11, 8.507059e+37 }
 0x2ef   :  { %v2453_v9 = vmul.f32 %v3713_v31, %v2452_v57  ;;  %v2025_v41 = vadd.f32 %v4141_v33, %v2024_v56 }
 0x2f1   :  { %v3715_v49 = vpop.eup %3714  ;;  %v2454_v0 = vadd.f32 %v3713_v31, %v2453_v9  ;;  %v3437_v52 = vmul.f32 -1.442695, %v2025_v41 }
 0x2f2   :  { %v3717_v20 = vpop.eup %3716  ;;  %v2168_v54 = vadd.f32 1.0, %v3715_v49 }
 0x2f3   :  { %v2458_v3 = vsel %vm2457_vm10, %v3713_v31, %v2454_v0  ;;  %v2466_v61 = vmul.f32 %v3717_v20, %v2167_v46  ;;  %3718 = vpow2.f32 %v3437_v52  ;;  %vm2471_vm12 = vweird.f32 %v3717_v20 }
 0x2f4   :  { %v2463_v1 = vsel %vm2460_vm11, %v2462_v27, %v2458_v3  ;;  %3720 = vrcp.f32 %v2168_v54  ;;  %vm2472_vm14 = vmor %vm2470_vm13, %vm2471_vm12  ;;  %v2491_v15 = vand.u32 2147483648, %v2168_v54  ;;  %v2489_v34 = vand.u32 2147483647, %v2168_v54 }
 0x2f5   :  { %2678 = vst [vmem:[#allocation8 + $0x90] sm:$0xff] %v2463_v1  ;;  %v2467_v4 = vsub.f32 1.0, %v2466_v61  ;;  %vm2485_vm1 = vweird.f32 %v2168_v54 }
 0x2f6   :  { %v2027_v6 = vpop.f32.mrf.mxu3  ;;  %v2492_v23 = vor.u32 1.1754944e-38, %v2491_v15  ;;  %vm2490_vm3 = vcmp.eq.f32.partialorder %v2489_v34, 8.507059e+37 }
 0x2f7   :  { %v2468_v8 = vmul.f32 %v3717_v20, %v2467_v4  ;;  %v2028_v55 = vadd.f32 %v4141_v33, %v2027_v6 }
 0x2f9   :  { %v3719_v59 = vpop.eup %3718  ;;  %v2469_v43 = vadd.f32 %v3717_v20, %v2468_v8  ;;  %v3438_v5 = vmul.f32 -1.442695, %v2028_v55 }
 0x2fa   :  { %v3721_v29 = vpop.eup %3720  ;;  %v2169_v32 = vadd.f32 1.0, %v3719_v59 }
 0x2fb   :  { %v2473_v17 = vsel %vm2472_vm14, %v3717_v20, %v2469_v43  ;;  %v2481_v63 = vmul.f32 %v3721_v29, %v2168_v54  ;;  %3722 = vpow2.f32 %v3438_v5  ;;  %vm2486_vm0 = vweird.f32 %v3721_v29 }
 0x2fc   :  { %v2478_v12 = vsel %vm2475_vm15, %v2477_v24, %v2473_v17  ;;  %3724 = vrcp.f32 %v2169_v32  ;;  %vm2487_vm2 = vmor %vm2485_vm1, %vm2486_vm0  ;;  %v2506_v36 = vand.u32 2147483648, %v2169_v32  ;;  %v2504_v58 = vand.u32 2147483647, %v2169_v32 }
 0x2fd   :  { %2679 = vst [vmem:[#allocation8 + $0x98] sm:$0xff] %v2478_v12  ;;  %v2482_v39 = vsub.f32 1.0, %v2481_v63  ;;  %vm2500_vm5 = vweird.f32 %v2169_v32 }
 0x2fe   :  { %v2029_v21 = vpop.f32.mrf.mxu3  ;;  %v2507_v14 = vor.u32 1.1754944e-38, %v2506_v36  ;;  %vm2505_vm7 = vcmp.eq.f32.partialorder %v2504_v58, 8.507059e+37 }
 0x2ff   :  { %v2483_v60 = vmul.f32 %v3721_v29, %v2482_v39  ;;  %v2030_v19 = vadd.f32 %v4141_v33, %v2029_v21 }
 0x301   :  { %v3723_v18 = vpop.eup %3722  ;;  %v2484_v37 = vadd.f32 %v3721_v29, %v2483_v60  ;;  %v3439_v35 = vmul.f32 -1.442695, %v2030_v19 }
 0x302   :  { %v3725_v44 = vpop.eup %3724  ;;  %v2170_v7 = vadd.f32 1.0, %v3723_v18 }
 0x303   :  { %v2488_v40 = vsel %vm2487_vm2, %v3721_v29, %v2484_v37  ;;  %v2496_v42 = vmul.f32 %v3725_v44, %v2169_v32  ;;  %3726 = vpow2.f32 %v3439_v35  ;;  %vm2501_vm4 = vweird.f32 %v3725_v44 }
 0x304   :  { %v2493_v22 = vsel %vm2490_vm3, %v2492_v23, %v2488_v40  ;;  %3728 = vrcp.f32 %v2170_v7  ;;  %vm2502_vm6 = vmor %vm2500_vm5, %vm2501_vm4  ;;  %v2521_v16 = vand.u32 2147483648, %v2170_v7  ;;  %v2519_v53 = vand.u32 2147483647, %v2170_v7 }
 0x305   :  { %2680 = vst [vmem:[#allocation8 + $0xa0] sm:$0xff] %v2493_v22  ;;  %v2497_v25 = vsub.f32 1.0, %v2496_v42  ;;  %vm2515_vm9 = vweird.f32 %v2170_v7 }
 0x306   :  { %v2032_v10 = vpop.f32.mrf.mxu3  ;;  %v2522_v0 = vor.u32 1.1754944e-38, %v2521_v16  ;;  %vm2520_vm11 = vcmp.eq.f32.partialorder %v2519_v53, 8.507059e+37 }
 0x307   :  { %v2498_v51 = vmul.f32 %v3725_v44, %v2497_v25  ;;  %v2033_v28 = vadd.f32 %v4141_v33, %v2032_v10 }
 0x309   :  { %v3727_v30 = vpop.eup %3726  ;;  %v2499_v47 = vadd.f32 %v3725_v44, %v2498_v51  ;;  %v3440_v62 = vmul.f32 -1.442695, %v2033_v28 }
 0x30a   :  { %v3729_v26 = vpop.eup %3728  ;;  %v2171_v50 = vadd.f32 1.0, %v3727_v30 }
 0x30b   :  { %v2503_v31 = vsel %vm2502_vm6, %v3725_v44, %v2499_v47  ;;  %v2511_v38 = vmul.f32 %v3729_v26, %v2170_v7  ;;  %3730 = vpow2.f32 %v3440_v62  ;;  %vm2516_vm8 = vweird.f32 %v3729_v26 }
 0x30c   :  { %v2508_v46 = vsel %vm2505_vm7, %v2507_v14, %v2503_v31  ;;  %3732 = vrcp.f32 %v2171_v50  ;;  %vm2517_vm10 = vmor %vm2515_vm9, %vm2516_vm8  ;;  %v2536_v61 = vand.u32 2147483648, %v2171_v50  ;;  %v2534_v2 = vand.u32 2147483647, %v2171_v50 }
 0x30d   :  { %2681 = vst [vmem:[#allocation8 + $0xa8] sm:$0xff] %v2508_v46  ;;  %v2512_v45 = vsub.f32 1.0, %v2511_v38  ;;  %vm2530_vm13 = vweird.f32 %v2171_v50 }
 0x30e   :  { %v2034_v48 = vpop.f32.mrf.mxu3  ;;  %v2537_v43 = vor.u32 1.1754944e-38, %v2536_v61  ;;  %vm2535_vm15 = vcmp.eq.f32.partialorder %v2534_v2, 8.507059e+37 }
 0x30f   :  { %v2513_v57 = vmul.f32 %v3729_v26, %v2512_v45  ;;  %v2035_v56 = vadd.f32 %v4141_v33, %v2034_v48 }
 0x311   :  { %v3731_v9 = vpop.eup %3730  ;;  %v2514_v13 = vadd.f32 %v3729_v26, %v2513_v57  ;;  %v3441_v41 = vmul.f32 -1.442695, %v2035_v56 }
 0x312   :  { %v3733_v49 = vpop.eup %3732  ;;  %v2172_v52 = vadd.f32 1.0, %v3731_v9 }
 0x313   :  { %v2518_v20 = vsel %vm2517_vm10, %v3729_v26, %v2514_v13  ;;  %v2526_v27 = vmul.f32 %v3733_v49, %v2171_v50  ;;  %3734 = vpow2.f32 %v3441_v41  ;;  %vm2531_vm12 = vweird.f32 %v3733_v49 }
 0x314   :  { %v2523_v54 = vsel %vm2520_vm11, %v2522_v0, %v2518_v20  ;;  %3736 = vrcp.f32 %v2172_v52  ;;  %vm2532_vm14 = vmor %vm2530_vm13, %vm2531_vm12  ;;  %v2551_v63 = vand.u32 2147483648, %v2172_v52  ;;  %v2549_v15 = vand.u32 2147483647, %v2172_v52 }
 0x315   :  { %2682 = vst [vmem:[#allocation8 + $0xb0] sm:$0xff] %v2523_v54  ;;  %v2527_v3 = vsub.f32 1.0, %v2526_v27  ;;  %vm2545_vm1 = vweird.f32 %v2172_v52 }
 0x316   :  { %v2037_v1 = vpop.f32.mrf.mxu3  ;;  %v2552_v37 = vor.u32 1.1754944e-38, %v2551_v63  ;;  %vm2550_vm3 = vcmp.eq.f32.partialorder %v2549_v15, 8.507059e+37 }
 0x317   :  { %v2528_v4 = vmul.f32 %v3733_v49, %v2527_v3  ;;  %v2038_v6 = vadd.f32 %v4141_v33, %v2037_v1 }
 0x319   :  { %v3735_v8 = vpop.eup %3734  ;;  %v2529_v11 = vadd.f32 %v3733_v49, %v2528_v4  ;;  %v3442_v55 = vmul.f32 -1.442695, %v2038_v6 }
 0x31a   :  { %v3737_v59 = vpop.eup %3736  ;;  %v2173_v5 = vadd.f32 1.0, %v3735_v8 }
 0x31b   :  { %v2533_v29 = vsel %vm2532_vm14, %v3733_v49, %v2529_v11  ;;  %v2541_v24 = vmul.f32 %v3737_v59, %v2172_v52  ;;  %3738 = vpow2.f32 %v3442_v55  ;;  %vm2546_vm0 = vweird.f32 %v3737_v59 }
 0x31c   :  { %v2538_v32 = vsel %vm2535_vm15, %v2537_v43, %v2533_v29  ;;  %3740 = vrcp.f32 %v2173_v5  ;;  %vm2547_vm2 = vmor %vm2545_vm1, %vm2546_vm0  ;;  %v2566_v42 = vand.u32 2147483648, %v2173_v5  ;;  %v2564_v36 = vand.u32 2147483647, %v2173_v5 }
 0x31d   :  { %2683 = vst [vmem:[#allocation8 + $0xb8] sm:$0xff] %v2538_v32  ;;  %v2542_v17 = vsub.f32 1.0, %v2541_v24  ;;  %vm2560_vm5 = vweird.f32 %v2173_v5 }
 0x31e   :  { %v2039_v12 = vpop.f32.mrf.mxu3  ;;  %v2567_v47 = vor.u32 1.1754944e-38, %v2566_v42  ;;  %vm2565_vm7 = vcmp.eq.f32.partialorder %v2564_v36, 8.507059e+37 }
 0x31f   :  { %v2543_v39 = vmul.f32 %v3737_v59, %v2542_v17  ;;  %v2040_v21 = vadd.f32 %v4141_v33, %v2039_v12 }
 0x321   :  { %v3739_v60 = vpop.eup %3738  ;;  %v2544_v34 = vadd.f32 %v3737_v59, %v2543_v39  ;;  %v3443_v19 = vmul.f32 -1.442695, %v2040_v21 }
 0x322   :  { %v3741_v18 = vpop.eup %3740  ;;  %v2174_v35 = vadd.f32 1.0, %v3739_v60 }
 0x323   :  { %v2548_v44 = vsel %vm2547_vm2, %v3737_v59, %v2544_v34  ;;  %v2556_v23 = vmul.f32 %v3741_v18, %v2173_v5  ;;  %3742 = vpow2.f32 %v3443_v19  ;;  %vm2561_vm4 = vweird.f32 %v3741_v18 }
 0x324   :  { %v2553_v7 = vsel %vm2550_vm3, %v2552_v37, %v2548_v44  ;;  %3744 = vrcp.f32 %v2174_v35  ;;  %vm2562_vm6 = vmor %vm2560_vm5, %vm2561_vm4  ;;  %v2581_v38 = vand.u32 2147483648, %v2174_v35  ;;  %v2579_v16 = vand.u32 2147483647, %v2174_v35 }
 0x325   :  { %2684 = vst [vmem:[#allocation8 + $0xc0] sm:$0xff] %v2553_v7  ;;  %v2557_v40 = vsub.f32 1.0, %v2556_v23  ;;  %vm2575_vm9 = vweird.f32 %v2174_v35 }
 0x326   :  { %v2042_v22 = vpop.f32.mrf.mxu3  ;;  %v2582_v13 = vor.u32 1.1754944e-38, %v2581_v38  ;;  %vm2580_vm11 = vcmp.eq.f32.partialorder %v2579_v16, 8.507059e+37 }
 0x327   :  { %v2558_v25 = vmul.f32 %v3741_v18, %v2557_v40  ;;  %v2043_v10 = vadd.f32 %v4141_v33, %v2042_v22 }
 0x329   :  { %v3743_v51 = vpop.eup %3742  ;;  %v2559_v58 = vadd.f32 %v3741_v18, %v2558_v25  ;;  %v3444_v28 = vmul.f32 -1.442695, %v2043_v10 }
 0x32a   :  { %v3745_v30 = vpop.eup %3744  ;;  %v2175_v62 = vadd.f32 1.0, %v3743_v51 }
 0x32b   :  { %v2563_v26 = vsel %vm2562_vm6, %v3741_v18, %v2559_v58  ;;  %v2571_v14 = vmul.f32 %v3745_v30, %v2174_v35  ;;  %3746 = vpow2.f32 %v3444_v28  ;;  %vm2576_vm8 = vweird.f32 %v3745_v30 }
 0x32c   :  { %v2568_v50 = vsel %vm2565_vm7, %v2567_v47, %v2563_v26  ;;  %3748 = vrcp.f32 %v2175_v62  ;;  %vm2577_vm10 = vmor %vm2575_vm9, %vm2576_vm8  ;;  %v2596_v27 = vand.u32 2147483648, %v2175_v62  ;;  %v2594_v61 = vand.u32 2147483647, %v2175_v62 }
 0x32d   :  { %2685 = vst [vmem:[#allocation8 + $0xc8] sm:$0xff] %v2568_v50  ;;  %v2572_v31 = vsub.f32 1.0, %v2571_v14  ;;  %vm2590_vm13 = vweird.f32 %v2175_v62 }
 0x32e   :  { %v2044_v46 = vpop.f32.mrf.mxu3  ;;  %v2597_v11 = vor.u32 1.1754944e-38, %v2596_v27  ;;  %vm2595_vm15 = vcmp.eq.f32.partialorder %v2594_v61, 8.507059e+37 }
 0x32f   :  { %v2573_v45 = vmul.f32 %v3745_v30, %v2572_v31  ;;  %v2045_v48 = vadd.f32 %v4141_v33, %v2044_v46 }
 0x331   :  { %v3747_v57 = vpop.eup %3746  ;;  %v2574_v53 = vadd.f32 %v3745_v30, %v2573_v45  ;;  %v3445_v56 = vmul.f32 -1.442695, %v2045_v48 }
 0x332   :  { %v3749_v9 = vpop.eup %3748  ;;  %v2176_v41 = vadd.f32 1.0, %v3747_v57 }
 0x333   :  { %v2578_v49 = vsel %vm2577_vm10, %v3745_v30, %v2574_v53  ;;  %v2586_v0 = vmul.f32 %v3749_v9, %v2175_v62  ;;  %3750 = vpow2.f32 %v3445_v56  ;;  %vm2591_vm12 = vweird.f32 %v3749_v9 }
 0x334   :  { %v2583_v52 = vsel %vm2580_vm11, %v2582_v13, %v2578_v49  ;;  %3752 = vrcp.f32 %v2176_v41  ;;  %vm2592_vm14 = vmor %vm2590_vm13, %vm2591_vm12  ;;  %v2611_v24 = vand.u32 2147483648, %v2176_v41  ;;  %v2609_v63 = vand.u32 2147483647, %v2176_v41 }
 0x335   :  { %2686 = vst [vmem:[#allocation8 + $0xd0] sm:$0xff] %v2583_v52  ;;  %v2587_v20 = vsub.f32 1.0, %v2586_v0  ;;  %vm2605_vm1 = vweird.f32 %v2176_v41 }
 0x336   :  { %v2047_v54 = vpop.f32.mrf.mxu3  ;;  %v2612_v34 = vor.u32 1.1754944e-38, %v2611_v24  ;;  %vm2610_vm3 = vcmp.eq.f32.partialorder %v2609_v63, 8.507059e+37 }
 0x337   :  { %v2588_v3 = vmul.f32 %v3749_v9, %v2587_v20  ;;  %v2048_v1 = vadd.f32 %v4141_v33, %v2047_v54 }
 0x339   :  { %v3751_v4 = vpop.eup %3750  ;;  %v2589_v2 = vadd.f32 %v3749_v9, %v2588_v3  ;;  %v3446_v6 = vmul.f32 -1.442695, %v2048_v1 }
 0x33a   :  { %v3753_v8 = vpop.eup %3752  ;;  %v2177_v55 = vadd.f32 1.0, %v3751_v4 }
 0x33b   :  { %v2593_v59 = vsel %vm2592_vm14, %v3749_v9, %v2589_v2  ;;  %v2601_v43 = vmul.f32 %v3753_v8, %v2176_v41  ;;  %3754 = vpow2.f32 %v3446_v6  ;;  %vm2606_vm0 = vweird.f32 %v3753_v8 }
 0x33c   :  { %v2598_v5 = vsel %vm2595_vm15, %v2597_v11, %v2593_v59  ;;  %3756 = vrcp.f32 %v2177_v55  ;;  %vm2607_vm2 = vmor %vm2605_vm1, %vm2606_vm0  ;;  %v2626_v23 = vand.u32 2147483648, %v2177_v55  ;;  %vm2620_vm5 = vweird.f32 %v2177_v55 }
 0x33d   :  { %2687 = vst [vmem:[#allocation8 + $0xd8] sm:$0xff] %v2598_v5  ;;  %v2602_v29 = vsub.f32 1.0, %v2601_v43 }
 0x33e   :  { %v2049_v32 = vpop.f32.mrf.mxu3  ;;  %v2627_v25 = vor.u32 1.1754944e-38, %v2626_v23 }
 0x33f   :  { %v2603_v17 = vmul.f32 %v3753_v8, %v2602_v29  ;;  %v2050_v12 = vadd.f32 %v4141_v33, %v2049_v32  ;;  %v2624_v33 = vand.u32 2147483647, %v2177_v55 }
 0x341   :  { %v3755_v39 = vpop.eup %3754  ;;  %v2604_v15 = vadd.f32 %v3753_v8, %v2603_v17  ;;  %v3447_v21 = vmul.f32 -1.442695, %v2050_v12  ;;  %vm2625_vm7 = vcmp.eq.f32.partialorder %v2624_v33, 8.507059e+37 }
 0x342   :  { %v3757_v60 = vpop.eup %3756  ;;  %v2178_v19 = vadd.f32 1.0, %v3755_v39 }
 0x343   :  { %v2608_v18 = vsel %vm2607_vm2, %v3753_v8, %v2604_v15  ;;  %v2616_v37 = vmul.f32 %v3757_v60, %v2177_v55  ;;  %3758 = vpow2.f32 %v3447_v21  ;;  %vm2621_vm4 = vweird.f32 %v3757_v60 }
 0x344   :  { %v2613_v35 = vsel %vm2610_vm3, %v2612_v34, %v2608_v18  ;;  %3760 = vrcp.f32 %v2178_v19  ;;  %vm2622_vm6 = vmor %vm2620_vm5, %vm2621_vm4  ;;  %v2641_v30 = vand.u32 2147483648, %v2178_v19  ;;  %v2639_v62 = vand.u32 2147483647, %v2178_v19 }
 0x345   :  { %2688 = vst [vmem:[#allocation8 + $0xe0] sm:$0xff] %v2613_v35  ;;  %v2617_v44 = vsub.f32 1.0, %v2616_v37  ;;  %vm2635_vm9 = vweird.f32 %v2178_v19 }
 0x346   :  { %v2642_v50 = vor.u32 1.1754944e-38, %v2641_v30  ;;  %vm2640_vm11 = vcmp.eq.f32.partialorder %v2639_v62, 8.507059e+37 }
 0x347   :  { %v2618_v7 = vmul.f32 %v3757_v60, %v2617_v44 }
 0x349   :  { %v3759_v40 = vpop.eup %3758  ;;  %v2619_v42 = vadd.f32 %v3757_v60, %v2618_v7 }
 0x34a   :  { %v3761_v22 = vpop.eup %3760  ;;  %v2179_v36 = vadd.f32 1.0, %v3759_v40 }
 0x34b   :  { %v2623_v10 = vsel %vm2622_vm6, %v3757_v60, %v2619_v42  ;;  %v2631_v51 = vmul.f32 %v3761_v22, %v2178_v19  ;;  %vm2636_vm8 = vweird.f32 %v3761_v22 }
 0x34c   :  { %v2628_v58 = vsel %vm2625_vm7, %v2627_v25, %v2623_v10  ;;  %3762 = vrcp.f32 %v2179_v36  ;;  %vm2637_vm10 = vmor %vm2635_vm9, %vm2636_vm8  ;;  %v2656_v16 = vand.u32 2147483648, %v2179_v36  ;;  %v2654_v57 = vand.u32 2147483647, %v2179_v36 }
 0x34d   :  { %2689 = vst [vmem:[#allocation8 + $0xe8] sm:$0xff] %v2628_v58  ;;  %v2632_v28 = vsub.f32 1.0, %v2631_v51  ;;  %vm2650_vm13 = vweird.f32 %v2179_v36 }
 0x34e   :  { %v2657_v56 = vor.u32 1.1754944e-38, %v2656_v16  ;;  %vm2655_vm15 = vcmp.eq.f32.partialorder %v2654_v57, 8.507059e+37 }
 0x34f   :  { %v2633_v47 = vmul.f32 %v3761_v22, %v2632_v28 }
 0x351   :  { %v2634_v26 = vadd.f32 %v3761_v22, %v2633_v47 }
 0x352   :  { %v3763_v14 = vpop.eup %3762 }
 0x353   :  { %v2638_v31 = vsel %vm2637_vm10, %v3761_v22, %v2634_v26  ;;  %v2646_v38 = vmul.f32 %v3763_v14, %v2179_v36  ;;  %vm2651_vm12 = vweird.f32 %v3763_v14 }
 0x354   :  { %v2643_v46 = vsel %vm2640_vm11, %v2642_v50, %v2638_v31  ;;  %vm2652_vm14 = vmor %vm2650_vm13, %vm2651_vm12 }
 0x355   :  { %2690 = vst [vmem:[#allocation8 + $0xf0] sm:$0xff] %v2643_v46  ;;  %v2647_v45 = vsub.f32 1.0, %v2646_v38 }
 0x357   :  { %v2648_v48 = vmul.f32 %v3763_v14, %v2647_v45 }
 0x359   :  { %v2649_v53 = vadd.f32 %v3763_v14, %v2648_v48 }
 0x35b   :  { %v2653_v9 = vsel %vm2652_vm14, %v3763_v14, %v2649_v53 }
 0x35c   :  { %v2658_v13 = vsel %vm2655_vm15, %v2657_v56, %v2653_v9 }
 0x35d   :  { %2691 = vst [vmem:[#allocation8 + $0xf8] sm:$0xff] %v2658_v13 }
 0x35e   :  { %2704 = dma.vmem_to_hbm [thread:$0]  %s2697_s14, 4096, %s2699_s17, [#allocation4], %s3875_s18, %s3875_s18, %s3876_s19  }
 0x35f   :  { %3865 = dma.done.wait [#allocation4], 4096  }
 0x360   :  { %3866 = vsyncadd [#allocation4], 4294963200 }
 0x361   :  { %2709 = vsyncpa [#allocation3], 1 }
 0x362   :  { %2710 = vsyncpa [#allocation6], 1 }
 0x363   :  { %2711 = vsyncpa [#allocation4], 1 }

</bundles_post_ra>
